<compile_context>
chip_gen: v7x
topology: tpu7x:2x2x1
jax: 0.10.0
libtpu: 0.0.40
codegen_flags: <defaults>
</compile_context>

<pallas_src>
import functools

import jax
import jax.numpy as jnp
from jax.experimental import pallas as pl
from jax.experimental.pallas import tpu as pltpu


def _lstm_lm_kernel(x_ref, h0_ref, c0_ref, wih_ref, whh_ref, b_ref,
                    embed_ref, bout_ref,
                    logits_ref, hout_ref, cout_ref,
                    gx_sc, hall_sc):
    """Fused LSTM-LM forward in a single kernel invocation.

    Refs (all VMEM):
      x_ref      : (T*B, H)  embedded inputs, time-major flat (row = t*B + b), bf16/f32
      h0_ref     : (B, H)    initial hidden state (f32)
      c0_ref     : (B, H)    initial cell state (f32)
      wih_ref    : (H, 4H)   input->gates weights (transposed PyTorch weight_ih_l0)
      whh_ref    : (H, 4H)   hidden->gates weights (transposed PyTorch weight_hh_l0)
      b_ref      : (1, 4H)   bias_ih + bias_hh (f32)
      embed_ref  : (V, H)    tied embedding / output-projection weight
      bout_ref   : (1, V)    linear bias (f32)
      logits_ref : (B*T, V)  output logits, PyTorch row order (row = b*T + t), f32
      hout_ref   : (B, H)    final hidden state (f32)
      cout_ref   : (B, H)    final cell state (f32)
      gx_sc      : (T*B, 4H) scratch: precomputed input-side gate activations (f32)
      hall_sc    : (B, T, H) scratch: all hidden states, batch-first (f32)
    """
    B, H = h0_ref.shape
    N = x_ref.shape[0]
    T = N // B
    mm_dtype = wih_ref.dtype            # matmul operand dtype (bf16 on v6e/v7x)

    # ---- Phase 1: batched input projection (off the recurrent chain) -------
    # One (T*B, H) @ (H, 4H) matmul + a single bias broadcast (hoisted out of
    # the time loop: JAX does not CSE broadcast_in_dim).
    gx_sc[...] = (jnp.dot(x_ref[...], wih_ref[...],
                          preferred_element_type=jnp.float32)
                  + b_ref[...])

    # ---- Phase 2: sequential recurrence (only h @ W_hh per step) -----------
    h = h0_ref[...]                     # f32 state
    c = c0_ref[...]
    w_hh = whh_ref[...]
    for t in range(T):                  # T small & static -> full unroll
        gates = (gx_sc[t * B:(t + 1) * B, :]
                 + jnp.dot(h.astype(mm_dtype), w_hh,
                           preferred_element_type=jnp.float32))   # (B, 4H)
        # PyTorch LSTM gate ordering: i, f, g, o ; gate math kept in f32.
        i_g = jax.nn.sigmoid(gates[:, 0 * H:1 * H])
        f_g = jax.nn.sigmoid(gates[:, 1 * H:2 * H])
        g_g = jnp.tanh(gates[:, 2 * H:3 * H])
        o_g = jax.nn.sigmoid(gates[:, 3 * H:4 * H])
        c = f_g * c + i_g * g_g
        h = o_g * jnp.tanh(c)
        hall_sc[:, t, :] = h            # store batch-first: (B, T, H)

    hout_ref[...] = h
    cout_ref[...] = c

    # ---- Phase 3: deferred tied vocab projection ----------------------------
    # logits[b*T + t, :] = h[b, t, :] @ embed_w.T + b_out, as ONE matmul,
    # contracted against embed_w directly (no materialized transpose).
    h_bt = hall_sc[...].reshape(B * T, H).astype(mm_dtype)
    logits_ref[...] = (
        jax.lax.dot_general(h_bt, embed_ref[...],
                            dimension_numbers=(((1,), (1,)), ((), ())),
                            preferred_element_type=jnp.float32)
        + bout_ref[...])


def model4_forward(token_ids, h0, c0, params, matmul_dtype=jnp.bfloat16):
    """Forward pass matching model4.forward(x, h) in eval mode.

    token_ids : (B, T) int32
    h0, c0    : (1, B, H) float32   (num_layers = 1)
    returns   : (logits (B*T, V), (h_n (1,B,H), c_n (1,B,H)))
    """
    embed_w = params["embed_w"]          # (V, H) f32 (tied with output proj)
    B, T = token_ids.shape
    V, H = embed_w.shape

    # Matmul operands in reduced precision (v6e/v7x MXU fast path, halves
    # weight DMA bytes); accumulation, gate math and h/c state stay f32.
    embed_mm = embed_w.astype(matmul_dtype)
    w_ih_mm = params["w_ih"].astype(matmul_dtype)
    w_hh_mm = params["w_hh"].astype(matmul_dtype)

    # Embedding lookup (glue gather) straight into time-major flattened
    # (T*B, H) layout: we transpose the tiny (B, T) int32 id matrix instead of
    # any (.., H)-sized activation, so there is no activation transpose at all.
    flat_ids = token_ids.T.reshape(-1)               # row index = t*B + b
    x_tm = jnp.take(embed_mm, flat_ids, axis=0)      # (T*B, H)
    # Dropout on the embedded input: identity (eval mode).

    logits, h_n, c_n = pl.pallas_call(
        _lstm_lm_kernel,
        out_shape=(
            jax.ShapeDtypeStruct((B * T, V), jnp.float32),   # row = b*T + t
            jax.ShapeDtypeStruct((B, H), jnp.float32),
            jax.ShapeDtypeStruct((B, H), jnp.float32),
        ),
        in_specs=[pl.BlockSpec(memory_space=pltpu.MemorySpace.VMEM)] * 8,
        out_specs=(
            pl.BlockSpec(memory_space=pltpu.MemorySpace.VMEM),
            pl.BlockSpec(memory_space=pltpu.MemorySpace.VMEM),
            pl.BlockSpec(memory_space=pltpu.MemorySpace.VMEM),
        ),
        scratch_shapes=[
            pltpu.VMEM((T * B, 4 * H), jnp.float32),   # gates_x
            pltpu.VMEM((B, T, H), jnp.float32),        # hidden states (batch-first)
        ],
    )(x_tm, h0[0], c0[0], w_ih_mm, w_hh_mm, params["b"], embed_mm,
      params["b_out"])

    # Dropout on the LSTM output: identity (eval mode).
    return logits, (h_n[None, ...], c_n[None, ...])


def _reference_forward(token_ids, h0, c0, params, matmul_dtype=jnp.bfloat16):
    """Pure-JAX reference (lax.scan) with identical precision policy."""
    embed_w = params["embed_w"]
    B, T = token_ids.shape
    V, H = embed_w.shape
    embed_mm = embed_w.astype(matmul_dtype)
    w_ih = params["w_ih"].astype(matmul_dtype)
    w_hh = params["w_hh"].astype(matmul_dtype)
    b = params["b"]
    b_out = params["b_out"]

    x_tm = jnp.take(embed_mm, token_ids.T, axis=0)        # (T, B, H)

    def step(carry, x_t):
        h, c = carry
        gates = (jnp.dot(x_t, w_ih, preferred_element_type=jnp.float32)
                 + jnp.dot(h.astype(matmul_dtype), w_hh,
                           preferred_element_type=jnp.float32)
                 + b)
        i = jax.nn.sigmoid(gates[:, 0 * H:1 * H])
        f = jax.nn.sigmoid(gates[:, 1 * H:2 * H])
        g = jnp.tanh(gates[:, 2 * H:3 * H])
        o = jax.nn.sigmoid(gates[:, 3 * H:4 * H])
        c_new = f * c + i * g
        h_new = o * jnp.tanh(c_new)
        return (h_new, c_new), h_new

    (h_n, c_n), hs = jax.lax.scan(step, (h0[0], c0[0]), x_tm)   # hs: (T, B, H)
    h_bt = jnp.transpose(hs, (1, 0, 2)).reshape(B * T, H).astype(matmul_dtype)
    logits = (jax.lax.dot_general(h_bt, embed_mm,
                                  dimension_numbers=(((1,), (1,)), ((), ())),
                                  preferred_element_type=jnp.float32)
              + b_out)
    return logits, (h_n[None, ...], c_n[None, ...])


def init_params(key, vocab_size, embed_size):
    """Deterministic init matching model4.__init__ shapes (values synthetic)."""
    H, V = embed_size, vocab_size
    k0, k1, k2, k3, k4 = jax.random.split(key, 5)
    embed_w = jax.random.uniform(k0, (V, H), jnp.float32, -0.1, 0.1)
    s = 1.0 / jnp.sqrt(H)
    # PyTorch stores weight_ih/hh as (4H, H); we keep them transposed (H, 4H).
    w_ih = jax.random.uniform(k1, (H, 4 * H), jnp.float32, -s, s)
    w_hh = jax.random.uniform(k2, (H, 4 * H), jnp.float32, -s, s)
    b_ih = jax.random.uniform(k3, (4 * H,), jnp.float32, -s, s)
    b_hh = jax.random.uniform(k4, (4 * H,), jnp.float32, -s, s)
    return {
        "embed_w": embed_w,                         # tied: linear.weight = embed.weight
        "w_ih": w_ih,
        "w_hh": w_hh,
        "b": (b_ih + b_hh)[None, :],
        "b_out": jnp.zeros((1, V), jnp.float32),    # linear.bias.data.fill_(0)
    }


if __name__ == "__main__":
    VOCAB = 256
    EMBED = 128
    B, T = 8, 8

    key = jax.random.PRNGKey(0)
    k_par, k_tok, k_h, k_c = jax.random.split(key, 4)

    params = init_params(k_par, VOCAB, EMBED)
    token_ids = jax.random.randint(k_tok, (B, T), 0, VOCAB, dtype=jnp.int32)
    h0 = jax.random.normal(k_h, (1, B, EMBED), jnp.float32) * 0.1
    c0 = jax.random.normal(k_c, (1, B, EMBED), jnp.float32) * 0.1

    fwd = jax.jit(functools.partial(model4_forward, params=params))
    logits, (h_n, c_n) = fwd(token_ids, h0, c0)
    jax.block_until_ready((logits, h_n, c_n))

    ref = jax.jit(functools.partial(_reference_forward, params=params))
    ref_logits, (ref_h, ref_c) = ref(token_ids, h0, c0)
    jax.block_until_ready((ref_logits, ref_h, ref_c))

    assert logits.shape == (B * T, VOCAB)
    assert h_n.shape == (1, B, EMBED) and c_n.shape == (1, B, EMBED)
    assert jnp.allclose(logits, ref_logits, atol=1e-3, rtol=1e-3), \
        float(jnp.max(jnp.abs(logits - ref_logits)))
    assert jnp.allclose(h_n, ref_h, atol=1e-3, rtol=1e-3)
    assert jnp.allclose(c_n, ref_c, atol=1e-3, rtol=1e-3)

    print("KERNEL_OK")
</pallas_src>

<mosaic_0001>
module attributes {stable_mosaic.version = 11 : i64} {
  func.func @_lstm_lm_kernel(%arg0: memref<64x128xbf16, #tpu.memory_space<vmem>>, %arg1: memref<8x128xf32, #tpu.memory_space<vmem>>, %arg2: memref<8x128xf32, #tpu.memory_space<vmem>>, %arg3: memref<128x512xbf16, #tpu.memory_space<vmem>>, %arg4: memref<128x512xbf16, #tpu.memory_space<vmem>>, %arg5: memref<1x512xf32, #tpu.memory_space<vmem>>, %arg6: memref<256x128xbf16, #tpu.memory_space<vmem>>, %arg7: memref<1x256xf32, #tpu.memory_space<vmem>>, %arg8: memref<64x256xf32, #tpu.memory_space<vmem>>, %arg9: memref<8x128xf32, #tpu.memory_space<vmem>>, %arg10: memref<8x128xf32, #tpu.memory_space<vmem>>, %arg11: memref<64x512xf32, #tpu.memory_space<vmem>>, %arg12: memref<8x8x128xf32, #tpu.memory_space<vmem>>) attributes {dimension_semantics = [], scalar_prefetch = 0 : i64, scratch_operands = 2 : i64, tpu.core_type = #tpu.core_type<tc>} {
    %c0 = arith.constant 0 : index
    %c0_0 = arith.constant 0 : index
    %0 = vector.load %arg0[%c0, %c0_0] : memref<64x128xbf16, #tpu.memory_space<vmem>>, vector<64x128xbf16>
    %c0_1 = arith.constant 0 : index
    %c0_2 = arith.constant 0 : index
    %1 = vector.load %arg3[%c0_1, %c0_2] : memref<128x512xbf16, #tpu.memory_space<vmem>>, vector<128x512xbf16>
    %cst = arith.constant dense<0.000000e+00> : vector<64x512xf32>
    %2 = tpu.matmul %0, %1, %cst {dimension_numbers = #tpu.dot_dimension_numbers<[1], [0], [0], [1], [0, 0, 1, 1], [], []>} : vector<64x128xbf16>, vector<128x512xbf16>, vector<64x512xf32> -> vector<64x512xf32>
    %c0_3 = arith.constant 0 : index
    %c0_4 = arith.constant 0 : index
    %3 = vector.load %arg5[%c0_3, %c0_4] : memref<1x512xf32, #tpu.memory_space<vmem>>, vector<1x512xf32>
    %4 = vector.broadcast %3 : vector<1x512xf32> to vector<64x512xf32>
    %5 = arith.addf %2, %4 : vector<64x512xf32>
    %c0_5 = arith.constant 0 : index
    %c0_6 = arith.constant 0 : index
    %6 = vector.load %arg11[%c0_5, %c0_6] : memref<64x512xf32, #tpu.memory_space<vmem>>, vector<64x512xf32>
    tpu.vector_store %arg11[%c0_5, %c0_6], %5 {strides = array<i32>} : memref<64x512xf32, #tpu.memory_space<vmem>>, vector<64x512xf32>,
    %c0_7 = arith.constant 0 : index
    %c0_8 = arith.constant 0 : index
    %7 = vector.load %arg1[%c0_7, %c0_8] : memref<8x128xf32, #tpu.memory_space<vmem>>, vector<8x128xf32>
    %c0_9 = arith.constant 0 : index
    %c0_10 = arith.constant 0 : index
    %8 = vector.load %arg2[%c0_9, %c0_10] : memref<8x128xf32, #tpu.memory_space<vmem>>, vector<8x128xf32>
    %c0_11 = arith.constant 0 : index
    %c0_12 = arith.constant 0 : index
    %9 = vector.load %arg4[%c0_11, %c0_12] : memref<128x512xbf16, #tpu.memory_space<vmem>>, vector<128x512xbf16>
    %c0_13 = arith.constant 0 : index
    %c0_14 = arith.constant 0 : index
    %10 = vector.load %arg11[%c0_13, %c0_14] : memref<64x512xf32, #tpu.memory_space<vmem>>, vector<8x512xf32>
    %11 = arith.truncf %7 : vector<8x128xf32> to vector<8x128xbf16>
    %cst_15 = arith.constant dense<0.000000e+00> : vector<8x512xf32>
    %12 = tpu.matmul %11, %9, %cst_15 {dimension_numbers = #tpu.dot_dimension_numbers<[1], [0], [0], [1], [0, 0, 1, 1], [], []>} : vector<8x128xbf16>, vector<128x512xbf16>, vector<8x512xf32> -> vector<8x512xf32>
    %13 = arith.addf %10, %12 : vector<8x512xf32>
    %14 = vector.extract_strided_slice %13 {offsets = [0, 0], sizes = [8, 128], strides = [1, 1]} : vector<8x512xf32> to vector<8x128xf32>
    %15 = arith.negf %14 : vector<8x128xf32>
    %16 = math.exp %15 : vector<8x128xf32>
    %cst_16 = arith.constant 1.000000e+00 : f32
    %17 = vector.broadcast %cst_16 : f32 to vector<8x128xf32>
    %18 = arith.addf %17, %16 : vector<8x128xf32>
    %19 = arith.divf %17, %18 : vector<8x128xf32>
    %20 = vector.extract_strided_slice %13 {offsets = [0, 128], sizes = [8, 128], strides = [1, 1]} : vector<8x512xf32> to vector<8x128xf32>
    %21 = arith.negf %20 : vector<8x128xf32>
    %22 = math.exp %21 : vector<8x128xf32>
    %cst_17 = arith.constant 1.000000e+00 : f32
    %23 = vector.broadcast %cst_17 : f32 to vector<8x128xf32>
    %24 = arith.addf %23, %22 : vector<8x128xf32>
    %25 = arith.divf %23, %24 : vector<8x128xf32>
    %26 = vector.extract_strided_slice %13 {offsets = [0, 256], sizes = [8, 128], strides = [1, 1]} : vector<8x512xf32> to vector<8x128xf32>
    %27 = math.tanh %26 : vector<8x128xf32>
    %28 = vector.extract_strided_slice %13 {offsets = [0, 384], sizes = [8, 128], strides = [1, 1]} : vector<8x512xf32> to vector<8x128xf32>
    %29 = arith.negf %28 : vector<8x128xf32>
    %30 = math.exp %29 : vector<8x128xf32>
    %cst_18 = arith.constant 1.000000e+00 : f32
    %31 = vector.broadcast %cst_18 : f32 to vector<8x128xf32>
    %32 = arith.addf %31, %30 : vector<8x128xf32>
    %33 = arith.divf %31, %32 : vector<8x128xf32>
    %34 = arith.mulf %25, %8 : vector<8x128xf32>
    %35 = arith.mulf %19, %27 : vector<8x128xf32>
    %36 = arith.addf %34, %35 : vector<8x128xf32>
    %37 = math.tanh %36 : vector<8x128xf32>
    %38 = arith.mulf %33, %37 : vector<8x128xf32>
    %c0_19 = arith.constant 0 : index
    %c0_20 = arith.constant 0 : index
    %c0_21 = arith.constant 0 : index
    %39 = vector.load %arg12[%c0_19, %c0_20, %c0_21] : memref<8x8x128xf32, #tpu.memory_space<vmem>>, vector<8x1x128xf32>
    %40 = vector.shape_cast %39 : vector<8x1x128xf32> to vector<8x128xf32>
    %41 = vector.shape_cast %38 : vector<8x128xf32> to vector<8x1x128xf32>
    tpu.vector_store %arg12[%c0_19, %c0_20, %c0_21], %41 {strides = array<i32>} : memref<8x8x128xf32, #tpu.memory_space<vmem>>, vector<8x1x128xf32>,
    %c8 = arith.constant 8 : index
    %c0_22 = arith.constant 0 : index
    %42 = vector.load %arg11[%c8, %c0_22] : memref<64x512xf32, #tpu.memory_space<vmem>>, vector<8x512xf32>
    %43 = arith.truncf %38 : vector<8x128xf32> to vector<8x128xbf16>
    %cst_23 = arith.constant dense<0.000000e+00> : vector<8x512xf32>
    %44 = tpu.matmul %43, %9, %cst_23 {dimension_numbers = #tpu.dot_dimension_numbers<[1], [0], [0], [1], [0, 0, 1, 1], [], []>} : vector<8x128xbf16>, vector<128x512xbf16>, vector<8x512xf32> -> vector<8x512xf32>
    %45 = arith.addf %42, %44 : vector<8x512xf32>
    %46 = vector.extract_strided_slice %45 {offsets = [0, 0], sizes = [8, 128], strides = [1, 1]} : vector<8x512xf32> to vector<8x128xf32>
    %47 = arith.negf %46 : vector<8x128xf32>
    %48 = math.exp %47 : vector<8x128xf32>
    %cst_24 = arith.constant 1.000000e+00 : f32
    %49 = vector.broadcast %cst_24 : f32 to vector<8x128xf32>
    %50 = arith.addf %49, %48 : vector<8x128xf32>
    %51 = arith.divf %49, %50 : vector<8x128xf32>
    %52 = vector.extract_strided_slice %45 {offsets = [0, 128], sizes = [8, 128], strides = [1, 1]} : vector<8x512xf32> to vector<8x128xf32>
    %53 = arith.negf %52 : vector<8x128xf32>
    %54 = math.exp %53 : vector<8x128xf32>
    %cst_25 = arith.constant 1.000000e+00 : f32
    %55 = vector.broadcast %cst_25 : f32 to vector<8x128xf32>
    %56 = arith.addf %55, %54 : vector<8x128xf32>
    %57 = arith.divf %55, %56 : vector<8x128xf32>
    %58 = vector.extract_strided_slice %45 {offsets = [0, 256], sizes = [8, 128], strides = [1, 1]} : vector<8x512xf32> to vector<8x128xf32>
    %59 = math.tanh %58 : vector<8x128xf32>
    %60 = vector.extract_strided_slice %45 {offsets = [0, 384], sizes = [8, 128], strides = [1, 1]} : vector<8x512xf32> to vector<8x128xf32>
    %61 = arith.negf %60 : vector<8x128xf32>
    %62 = math.exp %61 : vector<8x128xf32>
    %cst_26 = arith.constant 1.000000e+00 : f32
    %63 = vector.broadcast %cst_26 : f32 to vector<8x128xf32>
    %64 = arith.addf %63, %62 : vector<8x128xf32>
    %65 = arith.divf %63, %64 : vector<8x128xf32>
    %66 = arith.mulf %57, %36 : vector<8x128xf32>
    %67 = arith.mulf %51, %59 : vector<8x128xf32>
    %68 = arith.addf %66, %67 : vector<8x128xf32>
    %69 = math.tanh %68 : vector<8x128xf32>
    %70 = arith.mulf %65, %69 : vector<8x128xf32>
    %c0_27 = arith.constant 0 : index
    %c1 = arith.constant 1 : index
    %c0_28 = arith.constant 0 : index
    %71 = vector.load %arg12[%c0_27, %c1, %c0_28] : memref<8x8x128xf32, #tpu.memory_space<vmem>>, vector<8x1x128xf32>
    %72 = vector.shape_cast %71 : vector<8x1x128xf32> to vector<8x128xf32>
    %73 = vector.shape_cast %70 : vector<8x128xf32> to vector<8x1x128xf32>
    tpu.vector_store %arg12[%c0_27, %c1, %c0_28], %73 {strides = array<i32>} : memref<8x8x128xf32, #tpu.memory_space<vmem>>, vector<8x1x128xf32>,
    %c16 = arith.constant 16 : index
    %c0_29 = arith.constant 0 : index
    %74 = vector.load %arg11[%c16, %c0_29] : memref<64x512xf32, #tpu.memory_space<vmem>>, vector<8x512xf32>
    %75 = arith.truncf %70 : vector<8x128xf32> to vector<8x128xbf16>
    %cst_30 = arith.constant dense<0.000000e+00> : vector<8x512xf32>
    %76 = tpu.matmul %75, %9, %cst_30 {dimension_numbers = #tpu.dot_dimension_numbers<[1], [0], [0], [1], [0, 0, 1, 1], [], []>} : vector<8x128xbf16>, vector<128x512xbf16>, vector<8x512xf32> -> vector<8x512xf32>
    %77 = arith.addf %74, %76 : vector<8x512xf32>
    %78 = vector.extract_strided_slice %77 {offsets = [0, 0], sizes = [8, 128], strides = [1, 1]} : vector<8x512xf32> to vector<8x128xf32>
    %79 = arith.negf %78 : vector<8x128xf32>
    %80 = math.exp %79 : vector<8x128xf32>
    %cst_31 = arith.constant 1.000000e+00 : f32
    %81 = vector.broadcast %cst_31 : f32 to vector<8x128xf32>
    %82 = arith.addf %81, %80 : vector<8x128xf32>
    %83 = arith.divf %81, %82 : vector<8x128xf32>
    %84 = vector.extract_strided_slice %77 {offsets = [0, 128], sizes = [8, 128], strides = [1, 1]} : vector<8x512xf32> to vector<8x128xf32>
    %85 = arith.negf %84 : vector<8x128xf32>
    %86 = math.exp %85 : vector<8x128xf32>
    %cst_32 = arith.constant 1.000000e+00 : f32
    %87 = vector.broadcast %cst_32 : f32 to vector<8x128xf32>
    %88 = arith.addf %87, %86 : vector<8x128xf32>
    %89 = arith.divf %87, %88 : vector<8x128xf32>
    %90 = vector.extract_strided_slice %77 {offsets = [0, 256], sizes = [8, 128], strides = [1, 1]} : vector<8x512xf32> to vector<8x128xf32>
    %91 = math.tanh %90 : vector<8x128xf32>
    %92 = vector.extract_strided_slice %77 {offsets = [0, 384], sizes = [8, 128], strides = [1, 1]} : vector<8x512xf32> to vector<8x128xf32>
    %93 = arith.negf %92 : vector<8x128xf32>
    %94 = math.exp %93 : vector<8x128xf32>
    %cst_33 = arith.constant 1.000000e+00 : f32
    %95 = vector.broadcast %cst_33 : f32 to vector<8x128xf32>
    %96 = arith.addf %95, %94 : vector<8x128xf32>
    %97 = arith.divf %95, %96 : vector<8x128xf32>
    %98 = arith.mulf %89, %68 : vector<8x128xf32>
    %99 = arith.mulf %83, %91 : vector<8x128xf32>
    %100 = arith.addf %98, %99 : vector<8x128xf32>
    %101 = math.tanh %100 : vector<8x128xf32>
    %102 = arith.mulf %97, %101 : vector<8x128xf32>
    %c0_34 = arith.constant 0 : index
    %c2 = arith.constant 2 : index
    %c0_35 = arith.constant 0 : index
    %103 = vector.load %arg12[%c0_34, %c2, %c0_35] : memref<8x8x128xf32, #tpu.memory_space<vmem>>, vector<8x1x128xf32>
    %104 = vector.shape_cast %103 : vector<8x1x128xf32> to vector<8x128xf32>
    %105 = vector.shape_cast %102 : vector<8x128xf32> to vector<8x1x128xf32>
    tpu.vector_store %arg12[%c0_34, %c2, %c0_35], %105 {strides = array<i32>} : memref<8x8x128xf32, #tpu.memory_space<vmem>>, vector<8x1x128xf32>,
    %c24 = arith.constant 24 : index
    %c0_36 = arith.constant 0 : index
    %106 = vector.load %arg11[%c24, %c0_36] : memref<64x512xf32, #tpu.memory_space<vmem>>, vector<8x512xf32>
    %107 = arith.truncf %102 : vector<8x128xf32> to vector<8x128xbf16>
    %cst_37 = arith.constant dense<0.000000e+00> : vector<8x512xf32>
    %108 = tpu.matmul %107, %9, %cst_37 {dimension_numbers = #tpu.dot_dimension_numbers<[1], [0], [0], [1], [0, 0, 1, 1], [], []>} : vector<8x128xbf16>, vector<128x512xbf16>, vector<8x512xf32> -> vector<8x512xf32>
    %109 = arith.addf %106, %108 : vector<8x512xf32>
    %110 = vector.extract_strided_slice %109 {offsets = [0, 0], sizes = [8, 128], strides = [1, 1]} : vector<8x512xf32> to vector<8x128xf32>
    %111 = arith.negf %110 : vector<8x128xf32>
    %112 = math.exp %111 : vector<8x128xf32>
    %cst_38 = arith.constant 1.000000e+00 : f32
    %113 = vector.broadcast %cst_38 : f32 to vector<8x128xf32>
    %114 = arith.addf %113, %112 : vector<8x128xf32>
    %115 = arith.divf %113, %114 : vector<8x128xf32>
    %116 = vector.extract_strided_slice %109 {offsets = [0, 128], sizes = [8, 128], strides = [1, 1]} : vector<8x512xf32> to vector<8x128xf32>
    %117 = arith.negf %116 : vector<8x128xf32>
    %118 = math.exp %117 : vector<8x128xf32>
    %cst_39 = arith.constant 1.000000e+00 : f32
    %119 = vector.broadcast %cst_39 : f32 to vector<8x128xf32>
    %120 = arith.addf %119, %118 : vector<8x128xf32>
    %121 = arith.divf %119, %120 : vector<8x128xf32>
    %122 = vector.extract_strided_slice %109 {offsets = [0, 256], sizes = [8, 128], strides = [1, 1]} : vector<8x512xf32> to vector<8x128xf32>
    %123 = math.tanh %122 : vector<8x128xf32>
    %124 = vector.extract_strided_slice %109 {offsets = [0, 384], sizes = [8, 128], strides = [1, 1]} : vector<8x512xf32> to vector<8x128xf32>
    %125 = arith.negf %124 : vector<8x128xf32>
    %126 = math.exp %125 : vector<8x128xf32>
    %cst_40 = arith.constant 1.000000e+00 : f32
    %127 = vector.broadcast %cst_40 : f32 to vector<8x128xf32>
    %128 = arith.addf %127, %126 : vector<8x128xf32>
    %129 = arith.divf %127, %128 : vector<8x128xf32>
    %130 = arith.mulf %121, %100 : vector<8x128xf32>
    %131 = arith.mulf %115, %123 : vector<8x128xf32>
    %132 = arith.addf %130, %131 : vector<8x128xf32>
    %133 = math.tanh %132 : vector<8x128xf32>
    %134 = arith.mulf %129, %133 : vector<8x128xf32>
    %c0_41 = arith.constant 0 : index
    %c3 = arith.constant 3 : index
    %c0_42 = arith.constant 0 : index
    %135 = vector.load %arg12[%c0_41, %c3, %c0_42] : memref<8x8x128xf32, #tpu.memory_space<vmem>>, vector<8x1x128xf32>
    %136 = vector.shape_cast %135 : vector<8x1x128xf32> to vector<8x128xf32>
    %137 = vector.shape_cast %134 : vector<8x128xf32> to vector<8x1x128xf32>
    tpu.vector_store %arg12[%c0_41, %c3, %c0_42], %137 {strides = array<i32>} : memref<8x8x128xf32, #tpu.memory_space<vmem>>, vector<8x1x128xf32>,
    %c32 = arith.constant 32 : index
    %c0_43 = arith.constant 0 : index
    %138 = vector.load %arg11[%c32, %c0_43] : memref<64x512xf32, #tpu.memory_space<vmem>>, vector<8x512xf32>
    %139 = arith.truncf %134 : vector<8x128xf32> to vector<8x128xbf16>
    %cst_44 = arith.constant dense<0.000000e+00> : vector<8x512xf32>
    %140 = tpu.matmul %139, %9, %cst_44 {dimension_numbers = #tpu.dot_dimension_numbers<[1], [0], [0], [1], [0, 0, 1, 1], [], []>} : vector<8x128xbf16>, vector<128x512xbf16>, vector<8x512xf32> -> vector<8x512xf32>
    %141 = arith.addf %138, %140 : vector<8x512xf32>
    %142 = vector.extract_strided_slice %141 {offsets = [0, 0], sizes = [8, 128], strides = [1, 1]} : vector<8x512xf32> to vector<8x128xf32>
    %143 = arith.negf %142 : vector<8x128xf32>
    %144 = math.exp %143 : vector<8x128xf32>
    %cst_45 = arith.constant 1.000000e+00 : f32
    %145 = vector.broadcast %cst_45 : f32 to vector<8x128xf32>
    %146 = arith.addf %145, %144 : vector<8x128xf32>
    %147 = arith.divf %145, %146 : vector<8x128xf32>
    %148 = vector.extract_strided_slice %141 {offsets = [0, 128], sizes = [8, 128], strides = [1, 1]} : vector<8x512xf32> to vector<8x128xf32>
    %149 = arith.negf %148 : vector<8x128xf32>
    %150 = math.exp %149 : vector<8x128xf32>
    %cst_46 = arith.constant 1.000000e+00 : f32
    %151 = vector.broadcast %cst_46 : f32 to vector<8x128xf32>
    %152 = arith.addf %151, %150 : vector<8x128xf32>
    %153 = arith.divf %151, %152 : vector<8x128xf32>
    %154 = vector.extract_strided_slice %141 {offsets = [0, 256], sizes = [8, 128], strides = [1, 1]} : vector<8x512xf32> to vector<8x128xf32>
    %155 = math.tanh %154 : vector<8x128xf32>
    %156 = vector.extract_strided_slice %141 {offsets = [0, 384], sizes = [8, 128], strides = [1, 1]} : vector<8x512xf32> to vector<8x128xf32>
    %157 = arith.negf %156 : vector<8x128xf32>
    %158 = math.exp %157 : vector<8x128xf32>
    %cst_47 = arith.constant 1.000000e+00 : f32
    %159 = vector.broadcast %cst_47 : f32 to vector<8x128xf32>
    %160 = arith.addf %159, %158 : vector<8x128xf32>
    %161 = arith.divf %159, %160 : vector<8x128xf32>
    %162 = arith.mulf %153, %132 : vector<8x128xf32>
    %163 = arith.mulf %147, %155 : vector<8x128xf32>
    %164 = arith.addf %162, %163 : vector<8x128xf32>
    %165 = math.tanh %164 : vector<8x128xf32>
    %166 = arith.mulf %161, %165 : vector<8x128xf32>
    %c0_48 = arith.constant 0 : index
    %c4 = arith.constant 4 : index
    %c0_49 = arith.constant 0 : index
    %167 = vector.load %arg12[%c0_48, %c4, %c0_49] : memref<8x8x128xf32, #tpu.memory_space<vmem>>, vector<8x1x128xf32>
    %168 = vector.shape_cast %167 : vector<8x1x128xf32> to vector<8x128xf32>
    %169 = vector.shape_cast %166 : vector<8x128xf32> to vector<8x1x128xf32>
    tpu.vector_store %arg12[%c0_48, %c4, %c0_49], %169 {strides = array<i32>} : memref<8x8x128xf32, #tpu.memory_space<vmem>>, vector<8x1x128xf32>,
    %c40 = arith.constant 40 : index
    %c0_50 = arith.constant 0 : index
    %170 = vector.load %arg11[%c40, %c0_50] : memref<64x512xf32, #tpu.memory_space<vmem>>, vector<8x512xf32>
    %171 = arith.truncf %166 : vector<8x128xf32> to vector<8x128xbf16>
    %cst_51 = arith.constant dense<0.000000e+00> : vector<8x512xf32>
    %172 = tpu.matmul %171, %9, %cst_51 {dimension_numbers = #tpu.dot_dimension_numbers<[1], [0], [0], [1], [0, 0, 1, 1], [], []>} : vector<8x128xbf16>, vector<128x512xbf16>, vector<8x512xf32> -> vector<8x512xf32>
    %173 = arith.addf %170, %172 : vector<8x512xf32>
    %174 = vector.extract_strided_slice %173 {offsets = [0, 0], sizes = [8, 128], strides = [1, 1]} : vector<8x512xf32> to vector<8x128xf32>
    %175 = arith.negf %174 : vector<8x128xf32>
    %176 = math.exp %175 : vector<8x128xf32>
    %cst_52 = arith.constant 1.000000e+00 : f32
    %177 = vector.broadcast %cst_52 : f32 to vector<8x128xf32>
    %178 = arith.addf %177, %176 : vector<8x128xf32>
    %179 = arith.divf %177, %178 : vector<8x128xf32>
    %180 = vector.extract_strided_slice %173 {offsets = [0, 128], sizes = [8, 128], strides = [1, 1]} : vector<8x512xf32> to vector<8x128xf32>
    %181 = arith.negf %180 : vector<8x128xf32>
    %182 = math.exp %181 : vector<8x128xf32>
    %cst_53 = arith.constant 1.000000e+00 : f32
    %183 = vector.broadcast %cst_53 : f32 to vector<8x128xf32>
    %184 = arith.addf %183, %182 : vector<8x128xf32>
    %185 = arith.divf %183, %184 : vector<8x128xf32>
    %186 = vector.extract_strided_slice %173 {offsets = [0, 256], sizes = [8, 128], strides = [1, 1]} : vector<8x512xf32> to vector<8x128xf32>
    %187 = math.tanh %186 : vector<8x128xf32>
    %188 = vector.extract_strided_slice %173 {offsets = [0, 384], sizes = [8, 128], strides = [1, 1]} : vector<8x512xf32> to vector<8x128xf32>
    %189 = arith.negf %188 : vector<8x128xf32>
    %190 = math.exp %189 : vector<8x128xf32>
    %cst_54 = arith.constant 1.000000e+00 : f32
    %191 = vector.broadcast %cst_54 : f32 to vector<8x128xf32>
    %192 = arith.addf %191, %190 : vector<8x128xf32>
    %193 = arith.divf %191, %192 : vector<8x128xf32>
    %194 = arith.mulf %185, %164 : vector<8x128xf32>
    %195 = arith.mulf %179, %187 : vector<8x128xf32>
    %196 = arith.addf %194, %195 : vector<8x128xf32>
    %197 = math.tanh %196 : vector<8x128xf32>
    %198 = arith.mulf %193, %197 : vector<8x128xf32>
    %c0_55 = arith.constant 0 : index
    %c5 = arith.constant 5 : index
    %c0_56 = arith.constant 0 : index
    %199 = vector.load %arg12[%c0_55, %c5, %c0_56] : memref<8x8x128xf32, #tpu.memory_space<vmem>>, vector<8x1x128xf32>
    %200 = vector.shape_cast %199 : vector<8x1x128xf32> to vector<8x128xf32>
    %201 = vector.shape_cast %198 : vector<8x128xf32> to vector<8x1x128xf32>
    tpu.vector_store %arg12[%c0_55, %c5, %c0_56], %201 {strides = array<i32>} : memref<8x8x128xf32, #tpu.memory_space<vmem>>, vector<8x1x128xf32>,
    %c48 = arith.constant 48 : index
    %c0_57 = arith.constant 0 : index
    %202 = vector.load %arg11[%c48, %c0_57] : memref<64x512xf32, #tpu.memory_space<vmem>>, vector<8x512xf32>
    %203 = arith.truncf %198 : vector<8x128xf32> to vector<8x128xbf16>
    %cst_58 = arith.constant dense<0.000000e+00> : vector<8x512xf32>
    %204 = tpu.matmul %203, %9, %cst_58 {dimension_numbers = #tpu.dot_dimension_numbers<[1], [0], [0], [1], [0, 0, 1, 1], [], []>} : vector<8x128xbf16>, vector<128x512xbf16>, vector<8x512xf32> -> vector<8x512xf32>
    %205 = arith.addf %202, %204 : vector<8x512xf32>
    %206 = vector.extract_strided_slice %205 {offsets = [0, 0], sizes = [8, 128], strides = [1, 1]} : vector<8x512xf32> to vector<8x128xf32>
    %207 = arith.negf %206 : vector<8x128xf32>
    %208 = math.exp %207 : vector<8x128xf32>
    %cst_59 = arith.constant 1.000000e+00 : f32
    %209 = vector.broadcast %cst_59 : f32 to vector<8x128xf32>
    %210 = arith.addf %209, %208 : vector<8x128xf32>
    %211 = arith.divf %209, %210 : vector<8x128xf32>
    %212 = vector.extract_strided_slice %205 {offsets = [0, 128], sizes = [8, 128], strides = [1, 1]} : vector<8x512xf32> to vector<8x128xf32>
    %213 = arith.negf %212 : vector<8x128xf32>
    %214 = math.exp %213 : vector<8x128xf32>
    %cst_60 = arith.constant 1.000000e+00 : f32
    %215 = vector.broadcast %cst_60 : f32 to vector<8x128xf32>
    %216 = arith.addf %215, %214 : vector<8x128xf32>
    %217 = arith.divf %215, %216 : vector<8x128xf32>
    %218 = vector.extract_strided_slice %205 {offsets = [0, 256], sizes = [8, 128], strides = [1, 1]} : vector<8x512xf32> to vector<8x128xf32>
    %219 = math.tanh %218 : vector<8x128xf32>
    %220 = vector.extract_strided_slice %205 {offsets = [0, 384], sizes = [8, 128], strides = [1, 1]} : vector<8x512xf32> to vector<8x128xf32>
    %221 = arith.negf %220 : vector<8x128xf32>
    %222 = math.exp %221 : vector<8x128xf32>
    %cst_61 = arith.constant 1.000000e+00 : f32
    %223 = vector.broadcast %cst_61 : f32 to vector<8x128xf32>
    %224 = arith.addf %223, %222 : vector<8x128xf32>
    %225 = arith.divf %223, %224 : vector<8x128xf32>
    %226 = arith.mulf %217, %196 : vector<8x128xf32>
    %227 = arith.mulf %211, %219 : vector<8x128xf32>
    %228 = arith.addf %226, %227 : vector<8x128xf32>
    %229 = math.tanh %228 : vector<8x128xf32>
    %230 = arith.mulf %225, %229 : vector<8x128xf32>
    %c0_62 = arith.constant 0 : index
    %c6 = arith.constant 6 : index
    %c0_63 = arith.constant 0 : index
    %231 = vector.load %arg12[%c0_62, %c6, %c0_63] : memref<8x8x128xf32, #tpu.memory_space<vmem>>, vector<8x1x128xf32>
    %232 = vector.shape_cast %231 : vector<8x1x128xf32> to vector<8x128xf32>
    %233 = vector.shape_cast %230 : vector<8x128xf32> to vector<8x1x128xf32>
    tpu.vector_store %arg12[%c0_62, %c6, %c0_63], %233 {strides = array<i32>} : memref<8x8x128xf32, #tpu.memory_space<vmem>>, vector<8x1x128xf32>,
    %c56 = arith.constant 56 : index
    %c0_64 = arith.constant 0 : index
    %234 = vector.load %arg11[%c56, %c0_64] : memref<64x512xf32, #tpu.memory_space<vmem>>, vector<8x512xf32>
    %235 = arith.truncf %230 : vector<8x128xf32> to vector<8x128xbf16>
    %cst_65 = arith.constant dense<0.000000e+00> : vector<8x512xf32>
    %236 = tpu.matmul %235, %9, %cst_65 {dimension_numbers = #tpu.dot_dimension_numbers<[1], [0], [0], [1], [0, 0, 1, 1], [], []>} : vector<8x128xbf16>, vector<128x512xbf16>, vector<8x512xf32> -> vector<8x512xf32>
    %237 = arith.addf %234, %236 : vector<8x512xf32>
    %238 = vector.extract_strided_slice %237 {offsets = [0, 0], sizes = [8, 128], strides = [1, 1]} : vector<8x512xf32> to vector<8x128xf32>
    %239 = arith.negf %238 : vector<8x128xf32>
    %240 = math.exp %239 : vector<8x128xf32>
    %cst_66 = arith.constant 1.000000e+00 : f32
    %241 = vector.broadcast %cst_66 : f32 to vector<8x128xf32>
    %242 = arith.addf %241, %240 : vector<8x128xf32>
    %243 = arith.divf %241, %242 : vector<8x128xf32>
    %244 = vector.extract_strided_slice %237 {offsets = [0, 128], sizes = [8, 128], strides = [1, 1]} : vector<8x512xf32> to vector<8x128xf32>
    %245 = arith.negf %244 : vector<8x128xf32>
    %246 = math.exp %245 : vector<8x128xf32>
    %cst_67 = arith.constant 1.000000e+00 : f32
    %247 = vector.broadcast %cst_67 : f32 to vector<8x128xf32>
    %248 = arith.addf %247, %246 : vector<8x128xf32>
    %249 = arith.divf %247, %248 : vector<8x128xf32>
    %250 = vector.extract_strided_slice %237 {offsets = [0, 256], sizes = [8, 128], strides = [1, 1]} : vector<8x512xf32> to vector<8x128xf32>
    %251 = math.tanh %250 : vector<8x128xf32>
    %252 = vector.extract_strided_slice %237 {offsets = [0, 384], sizes = [8, 128], strides = [1, 1]} : vector<8x512xf32> to vector<8x128xf32>
    %253 = arith.negf %252 : vector<8x128xf32>
    %254 = math.exp %253 : vector<8x128xf32>
    %cst_68 = arith.constant 1.000000e+00 : f32
    %255 = vector.broadcast %cst_68 : f32 to vector<8x128xf32>
    %256 = arith.addf %255, %254 : vector<8x128xf32>
    %257 = arith.divf %255, %256 : vector<8x128xf32>
    %258 = arith.mulf %249, %228 : vector<8x128xf32>
    %259 = arith.mulf %243, %251 : vector<8x128xf32>
    %260 = arith.addf %258, %259 : vector<8x128xf32>
    %261 = math.tanh %260 : vector<8x128xf32>
    %262 = arith.mulf %257, %261 : vector<8x128xf32>
    %c0_69 = arith.constant 0 : index
    %c7 = arith.constant 7 : index
    %c0_70 = arith.constant 0 : index
    %263 = vector.load %arg12[%c0_69, %c7, %c0_70] : memref<8x8x128xf32, #tpu.memory_space<vmem>>, vector<8x1x128xf32>
    %264 = vector.shape_cast %263 : vector<8x1x128xf32> to vector<8x128xf32>
    %265 = vector.shape_cast %262 : vector<8x128xf32> to vector<8x1x128xf32>
    tpu.vector_store %arg12[%c0_69, %c7, %c0_70], %265 {strides = array<i32>} : memref<8x8x128xf32, #tpu.memory_space<vmem>>, vector<8x1x128xf32>,
    %c0_71 = arith.constant 0 : index
    %c0_72 = arith.constant 0 : index
    %266 = vector.load %arg9[%c0_71, %c0_72] : memref<8x128xf32, #tpu.memory_space<vmem>>, vector<8x128xf32>
    tpu.vector_store %arg9[%c0_71, %c0_72], %262 {strides = array<i32>} : memref<8x128xf32, #tpu.memory_space<vmem>>, vector<8x128xf32>,
    %c0_73 = arith.constant 0 : index
    %c0_74 = arith.constant 0 : index
    %267 = vector.load %arg10[%c0_73, %c0_74] : memref<8x128xf32, #tpu.memory_space<vmem>>, vector<8x128xf32>
    tpu.vector_store %arg10[%c0_73, %c0_74], %260 {strides = array<i32>} : memref<8x128xf32, #tpu.memory_space<vmem>>, vector<8x128xf32>,
    %c0_75 = arith.constant 0 : index
    %c0_76 = arith.constant 0 : index
    %c0_77 = arith.constant 0 : index
    %268 = vector.load %arg12[%c0_75, %c0_76, %c0_77] : memref<8x8x128xf32, #tpu.memory_space<vmem>>, vector<8x8x128xf32>
    %269 = vector.shape_cast %268 : vector<8x8x128xf32> to vector<64x128xf32>
    %270 = arith.truncf %269 : vector<64x128xf32> to vector<64x128xbf16>
    %c0_78 = arith.constant 0 : index
    %c0_79 = arith.constant 0 : index
    %271 = vector.load %arg6[%c0_78, %c0_79] : memref<256x128xbf16, #tpu.memory_space<vmem>>, vector<256x128xbf16>
    %cst_80 = arith.constant dense<0.000000e+00> : vector<64x256xf32>
    %272 = tpu.matmul %270, %271, %cst_80 {dimension_numbers = #tpu.dot_dimension_numbers<[1], [1], [0], [0], [0, 0, 1, 0], [], []>} : vector<64x128xbf16>, vector<256x128xbf16>, vector<64x256xf32> -> vector<64x256xf32>
    %c0_81 = arith.constant 0 : index
    %c0_82 = arith.constant 0 : index
    %273 = vector.load %arg7[%c0_81, %c0_82] : memref<1x256xf32, #tpu.memory_space<vmem>>, vector<1x256xf32>
    %274 = vector.broadcast %273 : vector<1x256xf32> to vector<64x256xf32>
    %275 = arith.addf %272, %274 : vector<64x256xf32>
    %c0_83 = arith.constant 0 : index
    %c0_84 = arith.constant 0 : index
    %276 = vector.load %arg8[%c0_83, %c0_84] : memref<64x256xf32, #tpu.memory_space<vmem>>, vector<64x256xf32>
    tpu.vector_store %arg8[%c0_83, %c0_84], %275 {strides = array<i32>} : memref<64x256xf32, #tpu.memory_space<vmem>>, vector<64x256xf32>,
    return
  }
}

</mosaic_0001>

<bundles_post_ra>
// kernel: model4_forward.1
= control target key start
LH: loop header
LB: loop body
LE: loop exit
PB: predicated region body
PF: predicated region fallthrough
CT: control target
= control target key end

     0   :  { %16 = vsyncpa [#allocation5], 0  ;;  %v3968_v2 = vmov 0   ;;  %s3955_s0 = inlined_call_operand.vmem [shape: bf16[64,128], index: 0, kind: input, shape index: {}]   ;;  %s3956_s1 = inlined_call_operand.vmem [shape: f32[8,128], index: 1, kind: input, shape index: {}]   ;;  %s3957_s2 = inlined_call_operand.vmem [shape: f32[8,128], index: 2, kind: input, shape index: {}]   ;;  %s3958_s3 = inlined_call_operand.vmem [shape: bf16[128,512], index: 3, kind: input, shape index: {}]   ;;  %s3959_s4 = inlined_call_operand.vmem [shape: bf16[128,512], index: 4, kind: input, shape index: {}]   ;;  %s3960_s5 = inlined_call_operand.vmem [shape: f32[1,512], index: 5, kind: input, shape index: {}]   ;;  %s3961_s6 = inlined_call_operand.vmem [shape: bf16[256,128], index: 6, kind: input, shape index: {}]   ;;  %s3962_s7 = inlined_call_operand.vmem [shape: f32[1,256], index: 7, kind: input, shape index: {}]   ;;  %s3963_s8 = inlined_call_operand.hbm [shape: f32[64,256], index: 8, kind: output, shape index: {0}]   ;;  %s3964_s9 = inlined_call_operand.hbm [shape: f32[8,128], index: 9, kind: output, shape index: {1}]   ;;  %s3965_s10 = inlined_call_operand.hbm [shape: f32[8,128], index: 10, kind: output, shape index: {2}]  }
   0x1   :  { %v2558_v0 = vld [vmem:[%s3958_s3 + $0x4] ss:$16 sps:$4 sm:$0xff]   ;;  %v2560_v1 = vld [vmem:[%s3958_s3] ss:$16 sps:$4 sm:$0xff]   ;;  %313 = vmatprep.mubr.bf16.mxu1 %v3968_v2  ;;  %690 = vmatprep.mubr.bf16.mxu0 %v3968_v2  ;;  %v2609_v33 = vld [vmem:[%s3958_s3 + $0xc] ss:$16 sps:$4 sm:$0xff]  }
   0x2   :  { %281 = vmatprep.subr.bf16.mxu1 %v2558_v0  ;;  %v2977_v3 = vld [vmem:[%s3959_s4 + $0x4] ss:$16 sps:$4 sm:$0xff]   ;;  %v2982_v4 = vld [vmem:[%s3959_s4] ss:$16 sps:$4 sm:$0xff]   ;;  %v2607_v36 = vld [vmem:[%s3958_s3 + $0x8] ss:$16 sps:$4 sm:$0xff]  }
   0x3   :  { %282 = vmatpush1.bf16.msra.mxu1 %v2560_v1  ;;  %v2564_v5 = vld [vmem:[%s3958_s3 + $0x24] ss:$16 sps:$4 sm:$0xff]   ;;  %v2566_v6 = vld [vmem:[%s3958_s3 + $0x20] ss:$16 sps:$4 sm:$0xff]   ;;  %658 = vmatprep.subr.bf16.mxu0 %v2977_v3  ;;  %v2612_v38 = vld [vmem:[%s3958_s3 + $0x2c] ss:$16 sps:$4 sm:$0xff]  }
   0x4   :  { %v2994_v7 = vld [vmem:[%s3959_s4 + $0x24] ss:$16 sps:$4 sm:$0xff]   ;;  %659 = vmatpush1.bf16.msra.mxu0 %v2982_v4  ;;  %283 = vmatprep.subr.bf16.mxu1 %v2564_v5  ;;  %v3000_v8 = vld [vmem:[%s3959_s4 + $0x20] ss:$16 sps:$4 sm:$0xff]   ;;  %v2610_v39 = vld [vmem:[%s3958_s3 + $0x28] ss:$16 sps:$4 sm:$0xff]  }
   0x5   :  { %660 = vmatprep.subr.bf16.mxu0 %v2994_v7  ;;  %v2570_v9 = vld [vmem:[%s3958_s3 + $0x44] ss:$16 sps:$4 sm:$0xff]   ;;  %v2572_v10 = vld [vmem:[%s3958_s3 + $0x40] ss:$16 sps:$4 sm:$0xff]   ;;  %v2616_v40 = vld [vmem:[%s3958_s3 + $0x4c] ss:$16 sps:$4 sm:$0xff]  }
   0x6   :  { %v3012_v11 = vld [vmem:[%s3959_s4 + $0x44] ss:$16 sps:$4 sm:$0xff]   ;;  %v3021_v13 = vld [vmem:[%s3959_s4 + $0x40] ss:$16 sps:$4 sm:$0xff]   ;;  %v2613_v41 = vld [vmem:[%s3955_s0 + $0x8] sm:$0xff]  }
   0x7   :  { %284 = vmatpush1.bf16.msra.mxu1 %v2566_v6  ;;  %v2576_v12 = vld [vmem:[%s3958_s3 + $0x64] ss:$16 sps:$4 sm:$0xff]   ;;  %v2578_v15 = vld [vmem:[%s3958_s3 + $0x60] ss:$16 sps:$4 sm:$0xff]   ;;  %v2614_v42 = vld [vmem:[%s3958_s3 + $0x48] ss:$16 sps:$4 sm:$0xff]  }
   0x8   :  { %285 = vmatprep.subr.bf16.mxu1 %v2570_v9  ;;  %661 = vmatpush1.bf16.msra.mxu0 %v3000_v8  ;;  %v3027_v14 = vld [vmem:[%s3959_s4 + $0x64] ss:$16 sps:$4 sm:$0xff]   ;;  %v3039_v17 = vld [vmem:[%s3959_s4 + $0x60] ss:$16 sps:$4 sm:$0xff]   ;;  %v2619_v43 = vld [vmem:[%s3958_s3 + $0x6c] ss:$16 sps:$4 sm:$0xff]  }
   0x9   :  { %662 = vmatprep.subr.bf16.mxu0 %v3012_v11  ;;  %v2582_v16 = vld [vmem:[%s3958_s3 + $0x84] ss:$16 sps:$4 sm:$0xff]   ;;  %v2584_v19 = vld [vmem:[%s3958_s3 + $0x80] ss:$16 sps:$4 sm:$0xff]   ;;  %v2617_v44 = vld [vmem:[%s3958_s3 + $0x68] ss:$16 sps:$4 sm:$0xff]  }
   0xa   :  { %v3045_v18 = vld [vmem:[%s3959_s4 + $0x84] ss:$16 sps:$4 sm:$0xff]   ;;  %v3057_v21 = vld [vmem:[%s3959_s4 + $0x80] ss:$16 sps:$4 sm:$0xff]   ;;  %v2623_v45 = vld [vmem:[%s3958_s3 + $0x8c] ss:$16 sps:$4 sm:$0xff]  }
   0xb   :  { %286 = vmatpush1.bf16.msra.mxu1 %v2572_v10  ;;  %v2588_v20 = vld [vmem:[%s3958_s3 + $0xa4] ss:$16 sps:$4 sm:$0xff]   ;;  %v2590_v23 = vld [vmem:[%s3958_s3 + $0xa0] ss:$16 sps:$4 sm:$0xff]   ;;  %v2621_v47 = vld [vmem:[%s3958_s3 + $0x88] ss:$16 sps:$4 sm:$0xff]  }
   0xc   :  { %287 = vmatprep.subr.bf16.mxu1 %v2576_v12  ;;  %663 = vmatpush1.bf16.msra.mxu0 %v3021_v13  ;;  %v3063_v22 = vld [vmem:[%s3959_s4 + $0xa4] ss:$16 sps:$4 sm:$0xff]   ;;  %v3075_v25 = vld [vmem:[%s3959_s4 + $0xa0] ss:$16 sps:$4 sm:$0xff]   ;;  %v2626_v48 = vld [vmem:[%s3958_s3 + $0xac] ss:$16 sps:$4 sm:$0xff]  }
   0xd   :  { %664 = vmatprep.subr.bf16.mxu0 %v3027_v14  ;;  %v2594_v24 = vld [vmem:[%s3958_s3 + $0xc4] ss:$16 sps:$4 sm:$0xff]   ;;  %v2596_v27 = vld [vmem:[%s3958_s3 + $0xc0] ss:$16 sps:$4 sm:$0xff]   ;;  %v2624_v49 = vld [vmem:[%s3958_s3 + $0xa8] ss:$16 sps:$4 sm:$0xff]  }
   0xe   :  { %v3081_v26 = vld [vmem:[%s3959_s4 + $0xc4] ss:$16 sps:$4 sm:$0xff]   ;;  %v3093_v29 = vld [vmem:[%s3959_s4 + $0xc0] ss:$16 sps:$4 sm:$0xff]   ;;  %v2630_v50 = vld [vmem:[%s3958_s3 + $0xcc] ss:$16 sps:$4 sm:$0xff]  }
   0xf   :  { %288 = vmatpush1.bf16.msra.mxu1 %v2578_v15  ;;  %v2600_v28 = vld [vmem:[%s3958_s3 + $0xe4] ss:$16 sps:$4 sm:$0xff]   ;;  %v2602_v31 = vld [vmem:[%s3958_s3 + $0xe0] ss:$16 sps:$4 sm:$0xff]   ;;  %v2627_v51 = vld [vmem:[%s3955_s0 + $0x18] sm:$0xff]  }
  0x10   :  { %289 = vmatprep.subr.bf16.mxu1 %v2582_v16  ;;  %665 = vmatpush1.bf16.msra.mxu0 %v3039_v17  ;;  %v3099_v30 = vld [vmem:[%s3959_s4 + $0xe4] ss:$16 sps:$4 sm:$0xff]   ;;  %v3107_v32 = vld [vmem:[%s3959_s4 + $0xe0] ss:$16 sps:$4 sm:$0xff]   ;;  %v2628_v52 = vld [vmem:[%s3958_s3 + $0xc8] ss:$16 sps:$4 sm:$0xff]  }
  0x11   :  { %666 = vmatprep.subr.bf16.mxu0 %v3045_v18  ;;  %v459_v34 = vld [vmem:[%s3956_s1] sm:$0xff]  ;;  %v2620_v46 = vld [vmem:[%s3955_s0 + $0x10] sm:$0xff]   ;;  %v2633_v53 = vld [vmem:[%s3958_s3 + $0xec] ss:$16 sps:$4 sm:$0xff]  }
  0x12   :  { %v3120_v35 = vld [vmem:[%s3955_s0] sm:$0xff]   ;;  %v3125_v37 = vpack.c.bf16 %v459_v34, %v459_v34 }
  0x13   :  { %290 = vmatpush1.bf16.msra.mxu1 %v2584_v19 }
  0x14   :  { %291 = vmatprep.subr.bf16.mxu1 %v2588_v20  ;;  %667 = vmatpush1.bf16.msra.mxu0 %v3057_v21 }
  0x15   :  { %668 = vmatprep.subr.bf16.mxu0 %v3063_v22 }
  0x17   :  { %292 = vmatpush1.bf16.msra.mxu1 %v2590_v23 }
  0x18   :  { %293 = vmatprep.subr.bf16.mxu1 %v2594_v24  ;;  %669 = vmatpush1.bf16.msra.mxu0 %v3075_v25 }
  0x19   :  { %670 = vmatprep.subr.bf16.mxu0 %v3081_v26 }
  0x1b   :  { %294 = vmatpush1.bf16.msra.mxu1 %v2596_v27 }
  0x1c   :  { %295 = vmatprep.subr.bf16.mxu1 %v2600_v28  ;;  %671 = vmatpush1.bf16.msra.mxu0 %v3093_v29 }
  0x1d   :  { %672 = vmatprep.subr.bf16.mxu0 %v3099_v30 }
  0x1f   :  { %296 = vmatpush1.bf16.msra.mxu1 %v2602_v31 }
  0x20   :  { %354 = vmatprep.subr.bf16.mxu1 %v2609_v33  ;;  %673 = vmatpush1.bf16.msra.mxu0 %v3107_v32 }
  0x21   :  { %839 = vmatprep.subr.bf16.mxu0 %v2977_v3 }
  0x22   :  { %314 = vmatmul.mubr.bf16.vlgmr.msra.gmra.mrb[0].mxu1 %v3120_v35 }
  0x23   :  { %355 = vmatpush1.bf16.msra.mxu1 %v2607_v36  ;;  %323 = vmatprep.mubr.bf16.mxu1 %v3968_v2 }
  0x24   :  { %691 = vmatmul.mubr.bf16.vlgmr.msra.gmra.mrb[0].mxu0 %v3125_v37  ;;  %356 = vmatprep.subr.bf16.mxu1 %v2612_v38 }
  0x25   :  { %840 = vmatpush1.bf16.msra.mxu0 %v2982_v4  ;;  %871 = vmatprep.mubr.bf16.mxu0 %v3968_v2 }
  0x26   :  { %841 = vmatprep.subr.bf16.mxu0 %v2994_v7 }
  0x27   :  { %357 = vmatpush1.bf16.msra.mxu1 %v2610_v39 }
  0x28   :  { %358 = vmatprep.subr.bf16.mxu1 %v2616_v40 }
  0x29   :  { %842 = vmatpush1.bf16.msra.mxu0 %v3000_v8 }
  0x2a   :  { %324 = vmatmul.mubr.bf16.gmra.mrb[4].mxu1 %v2613_v41  ;;  %843 = vmatprep.subr.bf16.mxu0 %v3012_v11 }
  0x2b   :  { %359 = vmatpush1.bf16.msra.mxu1 %v2614_v42  ;;  %333 = vmatprep.mubr.bf16.mxu1 %v3968_v2 }
  0x2c   :  { %360 = vmatprep.subr.bf16.mxu1 %v2619_v43 }
  0x2d   :  { %844 = vmatpush1.bf16.msra.mxu0 %v3021_v13 }
  0x2e   :  { %845 = vmatprep.subr.bf16.mxu0 %v3027_v14 }
  0x2f   :  { %361 = vmatpush1.bf16.msra.mxu1 %v2617_v44 }
  0x30   :  { %362 = vmatprep.subr.bf16.mxu1 %v2623_v45 }
  0x31   :  { %846 = vmatpush1.bf16.msra.mxu0 %v3039_v17 }
  0x32   :  { %334 = vmatmul.mubr.bf16.gmra.mrb[8].mxu1 %v2620_v46  ;;  %847 = vmatprep.subr.bf16.mxu0 %v3045_v18 }
  0x33   :  { %363 = vmatpush1.bf16.msra.mxu1 %v2621_v47  ;;  %343 = vmatprep.mubr.bf16.mxu1 %v3968_v2 }
  0x34   :  { %364 = vmatprep.subr.bf16.mxu1 %v2626_v48 }
  0x35   :  { %848 = vmatpush1.bf16.msra.mxu0 %v3057_v21 }
  0x36   :  { %849 = vmatprep.subr.bf16.mxu0 %v3063_v22 }
  0x37   :  { %365 = vmatpush1.bf16.msra.mxu1 %v2624_v49 }
  0x38   :  { %366 = vmatprep.subr.bf16.mxu1 %v2630_v50 }
  0x39   :  { %850 = vmatpush1.bf16.msra.mxu0 %v3075_v25 }
  0x3a   :  { %344 = vmatmul.mubr.bf16.gmra.mrb[12].mxu1 %v2627_v51  ;;  %851 = vmatprep.subr.bf16.mxu0 %v3081_v26 }
  0x3b   :  { %17 = vsyncpa [#allocation7], 0  ;;  %367 = vmatpush1.bf16.msra.mxu1 %v2628_v52  ;;  %v2631_v54 = vld [vmem:[%s3958_s3 + $0xe8] ss:$16 sps:$4 sm:$0xff]   ;;  %386 = vmatprep.mubr.bf16.mxu1 %v3968_v2  ;;  %v3202_v55 = vld [vmem:[%s3959_s4 + $0xc] ss:$16 sps:$4 sm:$0xff]   ;;  %v77_v15 = vlaneseq }
  0x3c   :  { %368 = vmatprep.subr.bf16.mxu1 %v2633_v53  ;;  %v3209_v56 = vld [vmem:[%s3959_s4 + $0x8] ss:$16 sps:$4 sm:$0xff]   ;;  %v3215_v57 = vld [vmem:[%s3959_s4 + $0x2c] ss:$16 sps:$4 sm:$0xff]   ;;  %v75_v20 = vld [vmem:[%s3960_s5] sm:$0xf] }
  0x3d   :  { %852 = vmatpush1.bf16.msra.mxu0 %v3093_v29  ;;  %v3224_v58 = vld [vmem:[%s3959_s4 + $0x28] ss:$16 sps:$4 sm:$0xff]   ;;  %v3231_v59 = vld [vmem:[%s3959_s4 + $0x4c] ss:$16 sps:$4 sm:$0xff]   ;;  %v3323_v16 = vshrl.u32 %v77_v15, 7 }
  0x3e   :  { %853 = vmatprep.subr.bf16.mxu0 %v3099_v30  ;;  %v3237_v60 = vld [vmem:[%s3959_s4 + $0x48] ss:$16 sps:$4 sm:$0xff]   ;;  %v3243_v61 = vld [vmem:[%s3959_s4 + $0x6c] ss:$16 sps:$4 sm:$0xff]  }
  0x3f   :  { %369 = vmatpush1.bf16.msra.mxu1 %v2631_v54  ;;  %v3249_v62 = vld [vmem:[%s3959_s4 + $0x68] ss:$16 sps:$4 sm:$0xff]   ;;  %v3256_v63 = vld [vmem:[%s3959_s4 + $0x8c] ss:$16 sps:$4 sm:$0xff]   ;;  %v3967_v19 = vsub.s32 0, %v3323_v16  ;;  %v3966_v23 = vsub.s32 1, %v3323_v16 }
  0x40   :  { %699 = vmatprep.subr.bf16.mxu1 %v3202_v55  ;;  %v3262_v0 = vld [vmem:[%s3959_s4 + $0x88] ss:$16 sps:$4 sm:$0xff]   ;;  %v3268_v1 = vld [vmem:[%s3959_s4 + $0xac] ss:$16 sps:$4 sm:$0xff]  }
  0x41   :  { %854 = vmatpush1.bf16.msra.mxu0 %v3107_v32  ;;  %v3274_v5 = vld [vmem:[%s3959_s4 + $0xa8] ss:$16 sps:$4 sm:$0xff]   ;;  %v3281_v6 = vld [vmem:[%s3959_s4 + $0xcc] ss:$16 sps:$4 sm:$0xff]   ;;  %v80_v24 = vrot.slane %v75_v20, %v3967_v19  ;;  %v84_v27 = vrot.slane %v75_v20, %v3966_v23 }
  0x42   :  { %387 = vmatmul.mubr.bf16.vlgmr.msra.gmra.mrb[16].mxu1 %v3120_v35  ;;  %1020 = vmatprep.subr.bf16.mxu0 %v2977_v3  ;;  %v3287_v9 = vld [vmem:[%s3959_s4 + $0xc8] ss:$16 sps:$4 sm:$0xff]   ;;  %v3293_v10 = vld [vmem:[%s3959_s4 + $0xec] ss:$16 sps:$4 sm:$0xff]  }
  0x43   :  { %700 = vmatpush1.bf16.msra.mxu1 %v3209_v56  ;;  %396 = vmatprep.mubr.bf16.mxu1 %v3968_v2  ;;  %v3299_v12 = vld [vmem:[%s3959_s4 + $0xe8] ss:$16 sps:$4 sm:$0xff]  }
  0x44   :  { %701 = vmatprep.subr.bf16.mxu1 %v3215_v57 }
  0x47   :  { %702 = vmatpush1.bf16.msra.mxu1 %v3224_v58 }
  0x48   :  { %703 = vmatprep.subr.bf16.mxu1 %v3231_v59 }
  0x4a   :  { %397 = vmatmul.mubr.bf16.gmra.mrb[20].mxu1 %v2613_v41 }
  0x4b   :  { %704 = vmatpush1.bf16.msra.mxu1 %v3237_v60  ;;  %406 = vmatprep.mubr.bf16.mxu1 %v3968_v2 }
  0x4c   :  { %705 = vmatprep.subr.bf16.mxu1 %v3243_v61 }
  0x4f   :  { %706 = vmatpush1.bf16.msra.mxu1 %v3249_v62 }
  0x50   :  { %707 = vmatprep.subr.bf16.mxu1 %v3256_v63 }
  0x52   :  { %407 = vmatmul.mubr.bf16.gmra.mrb[24].mxu1 %v2620_v46 }
  0x53   :  { %708 = vmatpush1.bf16.msra.mxu1 %v3262_v0  ;;  %416 = vmatprep.mubr.bf16.mxu1 %v3968_v2 }
  0x54   :  { %709 = vmatprep.subr.bf16.mxu1 %v3268_v1 }
  0x57   :  { %710 = vmatpush1.bf16.msra.mxu1 %v3274_v5 }
  0x58   :  { %711 = vmatprep.subr.bf16.mxu1 %v3281_v6 }
  0x5a   :  { %417 = vmatmul.mubr.bf16.gmra.mrb[28].mxu1 %v2627_v51 }
  0x5b   :  { %712 = vmatpush1.bf16.msra.mxu1 %v3287_v9  ;;  %731 = vmatprep.mubr.bf16.mxu1 %v3968_v2 }
  0x5c   :  { %713 = vmatprep.subr.bf16.mxu1 %v3293_v10 }
  0x5f   :  { %714 = vmatpush1.bf16.msra.mxu1 %v3299_v12 }
  0x60   :  { %880 = vmatprep.subr.bf16.mxu1 %v3202_v55 }
  0x62   :  { %732 = vmatmul.mubr.bf16.vlgmr.msra.gmra.mrb[32].mxu1 %v3125_v37 }
  0x63   :  { %881 = vmatpush1.bf16.msra.mxu1 %v3209_v56  ;;  %912 = vmatprep.mubr.bf16.mxu1 %v3968_v2 }
  0x64   :  { %882 = vmatprep.subr.bf16.mxu1 %v3215_v57 }
  0x67   :  { %883 = vmatpush1.bf16.msra.mxu1 %v3224_v58 }
  0x68   :  { %884 = vmatprep.subr.bf16.mxu1 %v3231_v59 }
  0x6b   :  { %885 = vmatpush1.bf16.msra.mxu1 %v3237_v60 }
  0x6c   :  { %886 = vmatprep.subr.bf16.mxu1 %v3243_v61 }
  0x6f   :  { %887 = vmatpush1.bf16.msra.mxu1 %v3249_v62 }
  0x70   :  { %888 = vmatprep.subr.bf16.mxu1 %v3256_v63 }
  0x73   :  { %889 = vmatpush1.bf16.msra.mxu1 %v3262_v0 }
  0x74   :  { %890 = vmatprep.subr.bf16.mxu1 %v3268_v1 }
  0x77   :  { %891 = vmatpush1.bf16.msra.mxu1 %v3274_v5 }
  0x78   :  { %892 = vmatprep.subr.bf16.mxu1 %v3281_v6 }
  0x7b   :  { %893 = vmatpush1.bf16.msra.mxu1 %v3287_v9 }
  0x7c   :  { %894 = vmatprep.subr.bf16.mxu1 %v3293_v10 }
  0x7f   :  { %895 = vmatpush1.bf16.msra.mxu1 %v3299_v12 }
  0x80   :  { %1061 = vmatprep.subr.bf16.mxu1 %v3202_v55 }
  0xf5   :  { %v315_v28 = vpop.f32.mrb[0].mxu1 }
  0xf6   :  { %v316_v31 = vadd.f32 %v315_v28, %v80_v24  ;;  %v317_v33 = vpop.f32.mrb[1].mxu1 }
  0xf7   :  { %v318_v34 = vadd.f32 %v317_v33, %v84_v27  ;;  %v319_v35 = vpop.f32.mrb[2].mxu1  ;;  %v692_v36 = vpop.f32.mrb[0].mxu0 }
  0xf8   :  { %v3334_v37 = vadd.f32 %v319_v35, %v80_v24  ;;  %v740_v38 = vadd.f32 %v692_v36, %v316_v31  ;;  %v321_v39 = vpop.f32.mrb[3].mxu1  ;;  %v694_v40 = vpop.f32.mrb[1].mxu0 }
  0xf9   :  { %v3336_v41 = vadd.f32 %v321_v39, %v84_v27  ;;  %v741_v42 = vadd.f32 %v694_v40, %v318_v34  ;;  %v696_v43 = vpop.f32.mrb[2].mxu0 }
  0xfa   :  { %v697_v44 = vpop.f32.mrb[3].mxu0 }
  0xfd   :  { %v325_v45 = vpop.f32.mrb[4].mxu1 }
  0xfe   :  { %v3338_v46 = vadd.f32 %v325_v45, %v80_v24  ;;  %v327_v47 = vpop.f32.mrb[5].mxu1 }
  0xff   :  { %v3340_v48 = vadd.f32 %v327_v47, %v84_v27  ;;  %v329_v49 = vpop.f32.mrb[6].mxu1 }
 0x100   :  { %v3342_v50 = vadd.f32 %v329_v49, %v80_v24  ;;  %v331_v51 = vpop.f32.mrb[7].mxu1 }
 0x101   :  { %v3344_v52 = vadd.f32 %v331_v51, %v84_v27  ;;  %v87_v51 = vsub.s32 2, %v3323_v16 }
 0x103   :  { %3970 = vst [vmem:[#allocation11_spill] sm:$0xff] %v3344_v52 }
 0x105   :  { %v335_v53 = vpop.f32.mrb[8].mxu1 }
 0x106   :  { %v3346_v54 = vadd.f32 %v335_v53, %v80_v24  ;;  %v337_v15 = vpop.f32.mrb[9].mxu1  ;;  %v91_v53 = vsub.s32 3, %v3323_v16 }
 0x107   :  { %v3348_v28 = vadd.f32 %v337_v15, %v84_v27  ;;  %v339_v31 = vpop.f32.mrb[10].mxu1 }
 0x108   :  { %3971 = vst [vmem:[#allocation12_spill] sm:$0xff] %v3346_v54  ;;  %v3350_v33 = vadd.f32 %v339_v31, %v80_v24  ;;  %v341_v34 = vpop.f32.mrb[11].mxu1  ;;  %v88_v31 = vrot.slane %v75_v20, %v87_v51  ;;  %v92_v23 = vrot.slane %v75_v20, %v91_v53  ;;  %v2455_v20 = vmul.f32 -1.442695, %v740_v38 }
 0x109   :  { %3972 = vst [vmem:[#allocation13_spill] sm:$0xff] %v3348_v28  ;;  %v3352_v35 = vadd.f32 %v341_v34, %v84_v27 }
 0x10a   :  { %3973 = vst [vmem:[#allocation14_spill] sm:$0xff] %v3350_v33 }
 0x10b   :  { %3974 = vst [vmem:[#allocation15_spill] sm:$0xff] %v3352_v35 }
 0x10d   :  { %v345_v36 = vpop.f32.mrb[12].mxu1 }
 0x10e   :  { %v3354_v39 = vadd.f32 %v345_v36, %v80_v24  ;;  %v347_v40 = vpop.f32.mrb[13].mxu1 }
 0x10f   :  { %v3356_v43 = vadd.f32 %v347_v40, %v84_v27  ;;  %v349_v44 = vpop.f32.mrb[14].mxu1 }
 0x110   :  { %3975 = vst [vmem:[#allocation16_spill] sm:$0xff] %v3354_v39  ;;  %v3358_v45 = vadd.f32 %v349_v44, %v80_v24  ;;  %v351_v47 = vpop.f32.mrb[15].mxu1  ;;  %v2456_v39 = vmul.f32 -1.442695, %v741_v42 }
 0x111   :  { %3976 = vst [vmem:[#allocation17_spill] sm:$0xff] %v3356_v43  ;;  %v3360_v49 = vadd.f32 %v351_v47, %v84_v27 }
 0x112   :  { %3977 = vst [vmem:[#allocation18_spill] sm:$0xff] %v3358_v45  ;;  %2674 = vpow2.f32 %v2456_v39 }
 0x113   :  { %3978 = vst [vmem:[#allocation19_spill] sm:$0xff] %v3360_v49  ;;  %2676 = vpow2.f32 %v2455_v20 }
 0x115   :  { %v388_v15 = vpop.f32.mrb[16].mxu1 }
 0x116   :  { %v390_v34 = vpop.f32.mrb[17].mxu1 }
 0x117   :  { %v392_v19 = vpop.f32.mrb[18].mxu1 }
 0x118   :  { %v3364_v36 = vadd.f32 %v392_v19, %v88_v31  ;;  %v394_v2 = vpop.f32.mrb[19].mxu1 }
 0x119   :  { %v3366_v40 = vadd.f32 %v394_v2, %v92_v23 }
 0x11d   :  { %v398_v43 = vpop.f32.mrb[20].mxu1 }
 0x11e   :  { %v3368_v24 = vadd.f32 %v398_v43, %v88_v31  ;;  %v400_v44 = vpop.f32.mrb[21].mxu1 }
 0x11f   :  { %v3370_v27 = vadd.f32 %v400_v44, %v92_v23  ;;  %v402_v47 = vpop.f32.mrb[22].mxu1 }
 0x120   :  { %v3372_v49 = vadd.f32 %v402_v47, %v88_v31  ;;  %v404_v45 = vpop.f32.mrb[23].mxu1 }
 0x121   :  { %v3374_v51 = vadd.f32 %v404_v45, %v92_v23  ;;  %v2675_v45 = vpop.eup %2674 }
 0x122   :  { %v2677_v20 = vpop.eup %2676 }
 0x123   :  { %3979 = vst [vmem:[#allocation20_spill] sm:$0xff] %v3374_v51  ;;  %v391_v51 = vadd.f32 %v390_v34, %v92_v23 }
 0x125   :  { %v408_v19 = vpop.f32.mrb[24].mxu1 }
 0x126   :  { %v3376_v53 = vadd.f32 %v408_v19, %v88_v31  ;;  %v410_v2 = vpop.f32.mrb[25].mxu1 }
 0x127   :  { %v3378_v35 = vadd.f32 %v410_v2, %v92_v23  ;;  %v412_v43 = vpop.f32.mrb[26].mxu1 }
 0x128   :  { %3980 = vst [vmem:[#allocation21_spill] sm:$0xff] %v3376_v53  ;;  %v3380_v33 = vadd.f32 %v412_v43, %v88_v31  ;;  %v414_v44 = vpop.f32.mrb[27].mxu1  ;;  %v747_v43 = vadd.f32 1.0, %v2677_v20 }
 0x129   :  { %3981 = vst [vmem:[#allocation22_spill] sm:$0xff] %v3378_v35  ;;  %v3382_v28 = vadd.f32 %v414_v44, %v92_v23  ;;  %v753_v35 = vadd.f32 1.0, %v2675_v45 }
 0x12a   :  { %3982 = vst [vmem:[#allocation23_spill] sm:$0xff] %v3380_v33  ;;  %v389_v33 = vadd.f32 %v388_v15, %v88_v31 }
 0x12b   :  { %3983 = vst [vmem:[#allocation24_spill] sm:$0xff] %v3382_v28  ;;  %2678 = vrcp.f32 %v753_v35 }
 0x12c   :  { %2680 = vrcp.f32 %v747_v43 }
 0x12d   :  { %v418_v47 = vpop.f32.mrb[28].mxu1 }
 0x12e   :  { %v3384_v54 = vadd.f32 %v418_v47, %v88_v31  ;;  %v420_v42 = vpop.f32.mrb[29].mxu1 }
 0x12f   :  { %v3386_v38 = vadd.f32 %v420_v42, %v92_v23  ;;  %v422_v39 = vpop.f32.mrb[30].mxu1 }
 0x130   :  { %3984 = vst [vmem:[#allocation25_spill] sm:$0xff] %v3384_v54  ;;  %v3388_v19 = vadd.f32 %v422_v39, %v88_v31  ;;  %v424_v53 = vpop.f32.mrb[31].mxu1 }
 0x131   :  { %3985 = vst [vmem:[#allocation26_spill] sm:$0xff] %v3386_v38  ;;  %v3390_v2 = vadd.f32 %v424_v53, %v92_v23  ;;  %v460_v53 = vld [vmem:[%s3957_s2] sm:$0xff] }
 0x135   :  { %v733_v44 = vpop.f32.mrb[32].mxu1  ;;  %v2679_v39 = vpop.eup %2678 }
 0x136   :  { %v742_v28 = vadd.f32 %v733_v44, %v389_v33  ;;  %v735_v47 = vpop.f32.mrb[33].mxu1  ;;  %v2681_v45 = vpop.eup %2680  ;;  %v763_v15 = vmul.f32 %v2679_v39, %v460_v53 }
 0x137   :  { %v743_v54 = vadd.f32 %v735_v47, %v391_v51  ;;  %v737_v52 = vpop.f32.mrb[34].mxu1 }
 0x138   :  { %2682 = vtanh.f32 %v742_v28  ;;  %v738_v42 = vpop.f32.mrb[35].mxu1  ;;  %v2905_v52 = vmov 1966171168  }
 0x139   :  { %v2457_v38 = vmul.f32 -1.442695, %v743_v54  ;;  %v771_v28 = vunpack.c.l.s4 %v2905_v52 }
 0x13b   :  { %2684 = vpow2.f32 %v2457_v38  ;;  %v772_v54 = vunpack.c.0.s8 %v771_v28 }
 0x13d   :  { %v3399_v51 = vsub.s32 %v772_v54, %v3323_v16 }
 0x142   :  { %v2683_v20 = vpop.eup %2682 }
 0x143   :  { %v764_v23 = vmul.f32 %v2683_v20, %v2681_v45 }
 0x145   :  { %v2685_v31 = vpop.eup %2684  ;;  %v3395_v35 = vadd.f32 %v764_v23, %v763_v15 }
 0x146   :  { %v760_v33 = vadd.f32 1.0, %v2685_v31 }
 0x147   :  { %2686 = vtanh.f32 %v3395_v35 }
 0x148   :  { %2688 = vrcp.f32 %v760_v33  ;;  %v3986_v33 = vmov 0  }
 0x151   :  { %v2687_v34 = vpop.eup %2686 }
 0x152   :  { %v2689_v38 = vpop.eup %2688 }
 0x153   :  { %v767_v43 = vmul.f32 %v2689_v38, %v2687_v34 }
 0x155   :  { %v769_v44 = vcombine.high %v767_v43, %v767_v43  ;;  %v776_v47 = vrot.slane %v767_v43, %v3399_v51  ;;  %v838_v42 = vpack.c.bf16 %v767_v43, %v767_v43 }
 0x157   :  { %v783_v39 = vrot.slane %v769_v44, %v3399_v51  ;;  %v784_v53 = vcombine.high %v776_v47, %v776_v47  ;;  %v792_v45 = vrot.slane %v776_v47, %v3399_v51  ;;  %2458 = vst.sshfl [vmem:[#allocation3] sm:$0x1 pattern:$0x73625140] %v776_v47  ;;  %872 = vmatmul.mubr.bf16.vlgmr.msra.gmra.mrb[4].mxu0 %v838_v42 }
 0x158   :  { %913 = vmatmul.mubr.bf16.vlgmr.msra.gmra.mrb[36].mxu1 %v838_v42  ;;  %1021 = vmatpush1.bf16.msra.mxu0 %v2982_v4 }
 0x159   :  { %1062 = vmatpush1.bf16.msra.mxu1 %v3209_v56  ;;  %v785_v20 = vcombine.high %v783_v39, %v783_v39  ;;  %v799_v15 = vrot.slane %v783_v39, %v3399_v51  ;;  %v806_v23 = vrot.slane %v784_v53, %v3399_v51  ;;  %v814_v31 = vcombine.high %v792_v45, %v792_v45 }
 0x15a   :  { %2459 = vst.sshfl [vmem:[#allocation3 + $0x8] sm:$0x1 pattern:$0x73625140] %v784_v53  ;;  %1022 = vmatprep.subr.bf16.mxu0 %v2994_v7  ;;  %1063 = vmatprep.subr.bf16.mxu1 %v3215_v57 }
 0x15b   :  { %2460 = vst.sshfl [vmem:[#allocation3 + $0x20] sm:$0x1 pattern:$0x73625140] %v783_v39  ;;  %1052 = vmatprep.mubr.bf16.mxu0 %v3986_v33  ;;  %v813_v52 = vrot.slane %v785_v20, %v3399_v51  ;;  %v815_v28 = vcombine.high %v799_v15, %v799_v15  ;;  %v816_v54 = vcombine.high %v806_v23, %v806_v23  ;;  %828 = vst [vmem:[#allocation3 + $0x10] sm:$0x1] %v814_v31 }
 0x15c   :  { %2461 = vst.sshfl [vmem:[#allocation3 + $0x28] sm:$0x1 pattern:$0x73625140] %v785_v20  ;;  %1093 = vmatprep.mubr.bf16.mxu1 %v3986_v33  ;;  %1023 = vmatpush1.bf16.msra.mxu0 %v3000_v8 }
 0x15d   :  { %1064 = vmatpush1.bf16.msra.mxu1 %v3224_v58  ;;  %v817_v34 = vcombine.high %v813_v52, %v813_v52  ;;  %829 = vst [vmem:[#allocation3 + $0x18] sm:$0x1] %v816_v54  ;;  %832 = vst [vmem:[#allocation3 + $0x30] sm:$0x1] %v815_v28  ;;  %1024 = vmatprep.subr.bf16.mxu0 %v3012_v11 }
 0x15e   :  { %1065 = vmatprep.subr.bf16.mxu1 %v3231_v59 }
 0x15f   :  { %833 = vst [vmem:[#allocation3 + $0x38] sm:$0x1] %v817_v34 }
 0x160   :  { %1025 = vmatpush1.bf16.msra.mxu0 %v3021_v13 }
 0x161   :  { %1066 = vmatpush1.bf16.msra.mxu1 %v3237_v60  ;;  %1026 = vmatprep.subr.bf16.mxu0 %v3027_v14 }
 0x162   :  { %1067 = vmatprep.subr.bf16.mxu1 %v3243_v61 }
 0x164   :  { %1027 = vmatpush1.bf16.msra.mxu0 %v3039_v17 }
 0x165   :  { %1068 = vmatpush1.bf16.msra.mxu1 %v3249_v62  ;;  %1028 = vmatprep.subr.bf16.mxu0 %v3045_v18 }
 0x166   :  { %1069 = vmatprep.subr.bf16.mxu1 %v3256_v63 }
 0x168   :  { %1029 = vmatpush1.bf16.msra.mxu0 %v3057_v21 }
 0x169   :  { %1070 = vmatpush1.bf16.msra.mxu1 %v3262_v0  ;;  %1030 = vmatprep.subr.bf16.mxu0 %v3063_v22 }
 0x16a   :  { %1071 = vmatprep.subr.bf16.mxu1 %v3268_v1 }
 0x16c   :  { %1031 = vmatpush1.bf16.msra.mxu0 %v3075_v25 }
 0x16d   :  { %1072 = vmatpush1.bf16.msra.mxu1 %v3274_v5  ;;  %1032 = vmatprep.subr.bf16.mxu0 %v3081_v26 }
 0x16e   :  { %1073 = vmatprep.subr.bf16.mxu1 %v3281_v6 }
 0x170   :  { %1033 = vmatpush1.bf16.msra.mxu0 %v3093_v29 }
 0x171   :  { %1074 = vmatpush1.bf16.msra.mxu1 %v3287_v9  ;;  %1034 = vmatprep.subr.bf16.mxu0 %v3099_v30 }
 0x172   :  { %1075 = vmatprep.subr.bf16.mxu1 %v3293_v10 }
 0x174   :  { %1035 = vmatpush1.bf16.msra.mxu0 %v3107_v32 }
 0x175   :  { %1076 = vmatpush1.bf16.msra.mxu1 %v3299_v12  ;;  %1201 = vmatprep.subr.bf16.mxu0 %v2977_v3 }
 0x176   :  { %1242 = vmatprep.subr.bf16.mxu1 %v3202_v55 }
 0x22a   :  { %v873_v8 = vpop.f32.mrb[4].mxu0 }
 0x22b   :  { %v914_v38 = vpop.f32.mrb[36].mxu1  ;;  %v921_v43 = vadd.f32 %v873_v8, %v3334_v37  ;;  %v875_v47 = vpop.f32.mrb[5].mxu0 }
 0x22c   :  { %v923_v44 = vadd.f32 %v914_v38, %v3364_v36  ;;  %v916_v42 = vpop.f32.mrb[37].mxu1  ;;  %v922_v39 = vadd.f32 %v875_v47, %v3336_v41  ;;  %v877_v45 = vpop.f32.mrb[6].mxu0 }
 0x22d   :  { %v924_v53 = vadd.f32 %v916_v42, %v3366_v40  ;;  %v918_v20 = vpop.f32.mrb[38].mxu1  ;;  %v2462_v15 = vmul.f32 -1.442695, %v921_v43  ;;  %v878_v23 = vpop.f32.mrb[7].mxu0 }
 0x22e   :  { %v919_v31 = vpop.f32.mrb[39].mxu1  ;;  %v2463_v3 = vmul.f32 -1.442695, %v922_v39 }
 0x22f   :  { %2690 = vpow2.f32 %v2462_v15  ;;  %v2464_v52 = vmul.f32 -1.442695, %v924_v53 }
 0x230   :  { %2692 = vpow2.f32 %v2463_v3 }
 0x231   :  { %2694 = vpow2.f32 %v2464_v52 }
 0x232   :  { %2696 = vtanh.f32 %v923_v44 }
 0x239   :  { %v2691_v28 = vpop.eup %2690 }
 0x23a   :  { %v2693_v54 = vpop.eup %2692  ;;  %v928_v37 = vadd.f32 1.0, %v2691_v28 }
 0x23b   :  { %v934_v36 = vadd.f32 1.0, %v2693_v54  ;;  %v2695_v41 = vpop.eup %2694 }
 0x23c   :  { %2698 = vrcp.f32 %v928_v37  ;;  %v2697_v34 = vpop.eup %2696  ;;  %v941_v43 = vadd.f32 1.0, %v2695_v41  ;;  %v3464_v41 = vld [vmem:[%s3959_s4 + $0x20] ss:$16 sps:$4 sm:$0xff]  }
 0x23d   :  { %2700 = vrcp.f32 %v934_v36 }
 0x23e   :  { %2702 = vrcp.f32 %v941_v43 }
 0x246   :  { %v2699_v40 = vpop.eup %2698 }
 0x247   :  { %v2701_v8 = vpop.eup %2700  ;;  %v945_v38 = vmul.f32 %v2699_v40, %v2697_v34 }
 0x248   :  { %v944_v47 = vmul.f32 %v2701_v8, %v3395_v35  ;;  %v2703_v39 = vpop.eup %2702 }
 0x24a   :  { %v3446_v42 = vadd.f32 %v945_v38, %v944_v47 }
 0x24c   :  { %2704 = vtanh.f32 %v3446_v42 }
 0x256   :  { %v2705_v53 = vpop.eup %2704 }
 0x257   :  { %v948_v45 = vmul.f32 %v2705_v53, %v2703_v39 }
 0x259   :  { %v950_v44 = vcombine.high %v948_v45, %v948_v45  ;;  %v957_v20 = vrot.slane %v948_v45, %v3399_v51  ;;  %v1019_v15 = vpack.c.bf16 %v948_v45, %v948_v45 }
 0x25b   :  { %v964_v23 = vrot.slane %v950_v44, %v3399_v51  ;;  %v965_v31 = vcombine.high %v957_v20, %v957_v20  ;;  %v973_v3 = vrot.slane %v957_v20, %v3399_v51  ;;  %2465 = vst.sshfl [vmem:[#allocation3 + $0x1] sm:$0x1 pattern:$0x73625140] %v957_v20  ;;  %1053 = vmatmul.mubr.bf16.vlgmr.msra.gmra.mrb[8].mxu0 %v1019_v15 }
 0x25c   :  { %1094 = vmatmul.mubr.bf16.vlgmr.msra.gmra.mrb[40].mxu1 %v1019_v15  ;;  %1202 = vmatpush1.bf16.msra.mxu0 %v2982_v4 }
 0x25d   :  { %1243 = vmatpush1.bf16.msra.mxu1 %v3209_v56  ;;  %v966_v35 = vcombine.high %v964_v23, %v964_v23  ;;  %v980_v52 = vrot.slane %v964_v23, %v3399_v51  ;;  %v987_v28 = vrot.slane %v965_v31, %v3399_v51  ;;  %v995_v54 = vcombine.high %v973_v3, %v973_v3 }
 0x25e   :  { %2466 = vst.sshfl [vmem:[#allocation3 + $0x9] sm:$0x1 pattern:$0x73625140] %v965_v31  ;;  %1203 = vmatprep.subr.bf16.mxu0 %v2994_v7  ;;  %1244 = vmatprep.subr.bf16.mxu1 %v3215_v57 }
 0x25f   :  { %2467 = vst.sshfl [vmem:[#allocation3 + $0x21] sm:$0x1 pattern:$0x73625140] %v964_v23  ;;  %1233 = vmatprep.mubr.bf16.mxu0 %v3986_v33  ;;  %v994_v37 = vrot.slane %v966_v35, %v3399_v51  ;;  %v996_v36 = vcombine.high %v980_v52, %v980_v52  ;;  %v997_v4 = vcombine.high %v987_v28, %v987_v28  ;;  %1009 = vst [vmem:[#allocation3 + $0x11] sm:$0x1] %v995_v54 }
 0x260   :  { %2468 = vst.sshfl [vmem:[#allocation3 + $0x29] sm:$0x1 pattern:$0x73625140] %v966_v35  ;;  %1274 = vmatprep.mubr.bf16.mxu1 %v3986_v33  ;;  %1204 = vmatpush1.bf16.msra.mxu0 %v3464_v41 }
 0x261   :  { %1245 = vmatpush1.bf16.msra.mxu1 %v3224_v58  ;;  %v998_v7 = vcombine.high %v994_v37, %v994_v37  ;;  %1010 = vst [vmem:[#allocation3 + $0x19] sm:$0x1] %v997_v4  ;;  %1013 = vst [vmem:[#allocation3 + $0x31] sm:$0x1] %v996_v36  ;;  %1205 = vmatprep.subr.bf16.mxu0 %v3012_v11  ;;  %v3495_v11 = vld [vmem:[%s3959_s4 + $0x4] ss:$16 sps:$4 sm:$0xff]  }
 0x262   :  { %1246 = vmatprep.subr.bf16.mxu1 %v3231_v59 }
 0x263   :  { %1014 = vst [vmem:[#allocation3 + $0x39] sm:$0x1] %v998_v7 }
 0x264   :  { %1206 = vmatpush1.bf16.msra.mxu0 %v3021_v13 }
 0x265   :  { %1247 = vmatpush1.bf16.msra.mxu1 %v3237_v60  ;;  %1207 = vmatprep.subr.bf16.mxu0 %v3027_v14 }
 0x266   :  { %1248 = vmatprep.subr.bf16.mxu1 %v3243_v61 }
 0x268   :  { %1208 = vmatpush1.bf16.msra.mxu0 %v3039_v17 }
 0x269   :  { %1249 = vmatpush1.bf16.msra.mxu1 %v3249_v62  ;;  %1209 = vmatprep.subr.bf16.mxu0 %v3045_v18 }
 0x26a   :  { %1250 = vmatprep.subr.bf16.mxu1 %v3256_v63 }
 0x26c   :  { %1210 = vmatpush1.bf16.msra.mxu0 %v3057_v21 }
 0x26d   :  { %1251 = vmatpush1.bf16.msra.mxu1 %v3262_v0  ;;  %1211 = vmatprep.subr.bf16.mxu0 %v3063_v22 }
 0x26e   :  { %1252 = vmatprep.subr.bf16.mxu1 %v3268_v1 }
 0x270   :  { %1212 = vmatpush1.bf16.msra.mxu0 %v3075_v25 }
 0x271   :  { %1253 = vmatpush1.bf16.msra.mxu1 %v3274_v5  ;;  %1213 = vmatprep.subr.bf16.mxu0 %v3081_v26 }
 0x272   :  { %1254 = vmatprep.subr.bf16.mxu1 %v3281_v6 }
 0x274   :  { %1214 = vmatpush1.bf16.msra.mxu0 %v3093_v29 }
 0x275   :  { %1255 = vmatpush1.bf16.msra.mxu1 %v3287_v9  ;;  %1215 = vmatprep.subr.bf16.mxu0 %v3099_v30 }
 0x276   :  { %1256 = vmatprep.subr.bf16.mxu1 %v3293_v10 }
 0x278   :  { %1216 = vmatpush1.bf16.msra.mxu0 %v3107_v32 }
 0x279   :  { %1257 = vmatpush1.bf16.msra.mxu1 %v3299_v12  ;;  %1382 = vmatprep.subr.bf16.mxu0 %v3495_v11 }
 0x27a   :  { %1423 = vmatprep.subr.bf16.mxu1 %v3202_v55 }
 0x32e   :  { %v1054_v13 = vpop.f32.mrb[8].mxu0 }
 0x32f   :  { %v1095_v14 = vpop.f32.mrb[40].mxu1  ;;  %v1102_v17 = vadd.f32 %v1054_v13, %v3338_v46  ;;  %v1056_v21 = vpop.f32.mrb[9].mxu0 }
 0x330   :  { %v1104_v18 = vadd.f32 %v1095_v14, %v3368_v24  ;;  %v1097_v22 = vpop.f32.mrb[41].mxu1  ;;  %v1103_v25 = vadd.f32 %v1056_v21, %v3340_v48  ;;  %v1058_v29 = vpop.f32.mrb[10].mxu0 }
 0x331   :  { %v1105_v26 = vadd.f32 %v1097_v22, %v3370_v27  ;;  %v1099_v30 = vpop.f32.mrb[42].mxu1  ;;  %v2469_v32 = vmul.f32 -1.442695, %v1102_v17  ;;  %v1059_v34 = vpop.f32.mrb[11].mxu0  ;;  %v3522_v17 = vld [vmem:[%s3959_s4 + $0x24] ss:$16 sps:$4 sm:$0xff]  }
 0x332   :  { %v1100_v40 = vpop.f32.mrb[43].mxu1  ;;  %v2470_v8 = vmul.f32 -1.442695, %v1103_v25  ;;  %v3541_v29 = vld [vmem:[%s3959_s4 + $0x40] ss:$16 sps:$4 sm:$0xff]  }
 0x333   :  { %2706 = vpow2.f32 %v2469_v32  ;;  %v2471_v38 = vmul.f32 -1.442695, %v1105_v26  ;;  %v3534_v26 = vld [vmem:[%s3959_s4 + $0x44] ss:$16 sps:$4 sm:$0xff]   ;;  %v3555_v32 = vld [vmem:[%s3959_s4 + $0x60] ss:$16 sps:$4 sm:$0xff]  }
 0x334   :  { %2708 = vpow2.f32 %v2470_v8  ;;  %v3548_v30 = vld [vmem:[%s3959_s4 + $0x64] ss:$16 sps:$4 sm:$0xff]   ;;  %v3569_v40 = vld [vmem:[%s3959_s4 + $0x80] ss:$16 sps:$4 sm:$0xff]  }
 0x335   :  { %2710 = vpow2.f32 %v2471_v38  ;;  %v3562_v34 = vld [vmem:[%s3959_s4 + $0x84] ss:$16 sps:$4 sm:$0xff]   ;;  %v3583_v38 = vld [vmem:[%s3959_s4 + $0xa0] ss:$16 sps:$4 sm:$0xff]  }
 0x336   :  { %2712 = vtanh.f32 %v1104_v18  ;;  %v3576_v8 = vld [vmem:[%s3959_s4 + $0xa4] ss:$16 sps:$4 sm:$0xff]  }
 0x33d   :  { %v2707_v43 = vpop.eup %2706 }
 0x33e   :  { %v2709_v47 = vpop.eup %2708  ;;  %v1109_v46 = vadd.f32 1.0, %v2707_v43  ;;  %v3590_v43 = vld [vmem:[%s3959_s4 + $0xc4] ss:$16 sps:$4 sm:$0xff]  }
 0x33f   :  { %v1115_v24 = vadd.f32 1.0, %v2709_v47  ;;  %v2711_v48 = vpop.eup %2710  ;;  %v3597_v47 = vld [vmem:[%s3959_s4 + $0xc0] ss:$16 sps:$4 sm:$0xff]  }
 0x340   :  { %2714 = vrcp.f32 %v1109_v46  ;;  %v2713_v39 = vpop.eup %2712  ;;  %v1122_v44 = vadd.f32 1.0, %v2711_v48  ;;  %v3604_v46 = vld [vmem:[%s3959_s4 + $0xe4] ss:$16 sps:$4 sm:$0xff]  }
 0x341   :  { %2716 = vrcp.f32 %v1115_v24  ;;  %v3611_v24 = vld [vmem:[%s3959_s4 + $0xe0] ss:$16 sps:$4 sm:$0xff]  }
 0x342   :  { %2718 = vrcp.f32 %v1122_v44 }
 0x34a   :  { %v2715_v27 = vpop.eup %2714 }
 0x34b   :  { %v2717_v53 = vpop.eup %2716  ;;  %v1126_v45 = vmul.f32 %v2715_v27, %v2713_v39 }
 0x34c   :  { %v1125_v20 = vmul.f32 %v2717_v53, %v3446_v42  ;;  %v2719_v23 = vpop.eup %2718  ;;  %v3513_v42 = vld [vmem:[%s3959_s4] ss:$16 sps:$4 sm:$0xff]  }
 0x34e   :  { %v3504_v15 = vadd.f32 %v1126_v45, %v1125_v20  ;;  %v3987_v20 = vld [vmem:[#allocation11_spill] sm:$0xff] }
 0x350   :  { %2720 = vtanh.f32 %v3504_v15 }
 0x35a   :  { %v2721_v31 = vpop.eup %2720 }
 0x35b   :  { %v1129_v3 = vmul.f32 %v2721_v31, %v2719_v23  ;;  %v3988_v31 = vld [vmem:[#allocation20_spill] sm:$0xff] }
 0x35d   :  { %v1131_v35 = vcombine.high %v1129_v3, %v1129_v3  ;;  %v1138_v52 = vrot.slane %v1129_v3, %v3399_v51  ;;  %v1200_v28 = vpack.c.bf16 %v1129_v3, %v1129_v3 }
 0x35f   :  { %v1145_v54 = vrot.slane %v1131_v35, %v3399_v51  ;;  %v1146_v37 = vcombine.high %v1138_v52, %v1138_v52  ;;  %v1154_v36 = vrot.slane %v1138_v52, %v3399_v51  ;;  %2472 = vst.sshfl [vmem:[#allocation3 + $0x2] sm:$0x1 pattern:$0x73625140] %v1138_v52  ;;  %1234 = vmatmul.mubr.bf16.vlgmr.msra.gmra.mrb[12].mxu0 %v1200_v28 }
 0x360   :  { %1275 = vmatmul.mubr.bf16.vlgmr.msra.gmra.mrb[44].mxu1 %v1200_v28  ;;  %1383 = vmatpush1.bf16.msra.mxu0 %v3513_v42 }
 0x361   :  { %1424 = vmatpush1.bf16.msra.mxu1 %v3209_v56  ;;  %v1147_v4 = vcombine.high %v1145_v54, %v1145_v54  ;;  %v1161_v7 = vrot.slane %v1145_v54, %v3399_v51  ;;  %v1168_v13 = vrot.slane %v1146_v37, %v3399_v51  ;;  %v1176_v14 = vcombine.high %v1154_v36, %v1154_v36 }
 0x362   :  { %2473 = vst.sshfl [vmem:[#allocation3 + $0xa] sm:$0x1 pattern:$0x73625140] %v1146_v37  ;;  %1384 = vmatprep.subr.bf16.mxu0 %v3522_v17  ;;  %1425 = vmatprep.subr.bf16.mxu1 %v3215_v57 }
 0x363   :  { %2474 = vst.sshfl [vmem:[#allocation3 + $0x22] sm:$0x1 pattern:$0x73625140] %v1145_v54  ;;  %1414 = vmatprep.mubr.bf16.mxu0 %v3986_v33  ;;  %v1175_v18 = vrot.slane %v1147_v4, %v3399_v51  ;;  %v1177_v21 = vcombine.high %v1161_v7, %v1161_v7  ;;  %v1178_v22 = vcombine.high %v1168_v13, %v1168_v13  ;;  %1190 = vst [vmem:[#allocation3 + $0x12] sm:$0x1] %v1176_v14 }
 0x364   :  { %2475 = vst.sshfl [vmem:[#allocation3 + $0x2a] sm:$0x1 pattern:$0x73625140] %v1147_v4  ;;  %1455 = vmatprep.mubr.bf16.mxu1 %v3986_v33  ;;  %1385 = vmatpush1.bf16.msra.mxu0 %v3464_v41 }
 0x365   :  { %1426 = vmatpush1.bf16.msra.mxu1 %v3224_v58  ;;  %v1179_v25 = vcombine.high %v1175_v18, %v1175_v18  ;;  %1191 = vst [vmem:[#allocation3 + $0x1a] sm:$0x1] %v1178_v22  ;;  %1194 = vst [vmem:[#allocation3 + $0x32] sm:$0x1] %v1177_v21  ;;  %1386 = vmatprep.subr.bf16.mxu0 %v3534_v26 }
 0x366   :  { %1427 = vmatprep.subr.bf16.mxu1 %v3231_v59 }
 0x367   :  { %1195 = vst [vmem:[#allocation3 + $0x3a] sm:$0x1] %v1179_v25 }
 0x368   :  { %1387 = vmatpush1.bf16.msra.mxu0 %v3541_v29 }
 0x369   :  { %1428 = vmatpush1.bf16.msra.mxu1 %v3237_v60  ;;  %1388 = vmatprep.subr.bf16.mxu0 %v3548_v30 }
 0x36a   :  { %1429 = vmatprep.subr.bf16.mxu1 %v3243_v61 }
 0x36c   :  { %1389 = vmatpush1.bf16.msra.mxu0 %v3555_v32 }
 0x36d   :  { %1430 = vmatpush1.bf16.msra.mxu1 %v3249_v62  ;;  %1390 = vmatprep.subr.bf16.mxu0 %v3562_v34 }
 0x36e   :  { %1431 = vmatprep.subr.bf16.mxu1 %v3256_v63 }
 0x370   :  { %1391 = vmatpush1.bf16.msra.mxu0 %v3569_v40 }
 0x371   :  { %1432 = vmatpush1.bf16.msra.mxu1 %v3262_v0  ;;  %1392 = vmatprep.subr.bf16.mxu0 %v3576_v8 }
 0x372   :  { %1433 = vmatprep.subr.bf16.mxu1 %v3268_v1 }
 0x374   :  { %1393 = vmatpush1.bf16.msra.mxu0 %v3583_v38 }
 0x375   :  { %1434 = vmatpush1.bf16.msra.mxu1 %v3274_v5  ;;  %1394 = vmatprep.subr.bf16.mxu0 %v3590_v43 }
 0x376   :  { %1435 = vmatprep.subr.bf16.mxu1 %v3281_v6 }
 0x378   :  { %1395 = vmatpush1.bf16.msra.mxu0 %v3597_v47 }
 0x379   :  { %1436 = vmatpush1.bf16.msra.mxu1 %v3287_v9  ;;  %1396 = vmatprep.subr.bf16.mxu0 %v3604_v46 }
 0x37a   :  { %1437 = vmatprep.subr.bf16.mxu1 %v3293_v10 }
 0x37c   :  { %1397 = vmatpush1.bf16.msra.mxu0 %v3611_v24 }
 0x37d   :  { %1438 = vmatpush1.bf16.msra.mxu1 %v3299_v12  ;;  %1563 = vmatprep.subr.bf16.mxu0 %v3495_v11 }
 0x37e   :  { %1604 = vmatprep.subr.bf16.mxu1 %v3202_v55 }
 0x432   :  { %v1235_v48 = vpop.f32.mrb[12].mxu0 }
 0x433   :  { %v1276_v39 = vpop.f32.mrb[44].mxu1  ;;  %v1283_v27 = vadd.f32 %v1235_v48, %v3342_v50  ;;  %v1237_v45 = vpop.f32.mrb[13].mxu0 }
 0x434   :  { %v1285_v53 = vadd.f32 %v1276_v39, %v3372_v49  ;;  %v1278_v44 = vpop.f32.mrb[45].mxu1  ;;  %v1284_v23 = vadd.f32 %v1237_v45, %v3987_v20  ;;  %v1239_v35 = vpop.f32.mrb[14].mxu0 }
 0x435   :  { %v1286_v3 = vadd.f32 %v1278_v44, %v3988_v31  ;;  %v1280_v52 = vpop.f32.mrb[46].mxu1  ;;  %v2476_v28 = vmul.f32 -1.442695, %v1283_v27  ;;  %v1240_v54 = vpop.f32.mrb[15].mxu0 }
 0x436   :  { %v1281_v37 = vpop.f32.mrb[47].mxu1  ;;  %v2477_v36 = vmul.f32 -1.442695, %v1284_v23 }
 0x437   :  { %2722 = vpow2.f32 %v2476_v28  ;;  %v2478_v55 = vmul.f32 -1.442695, %v1286_v3 }
 0x438   :  { %2724 = vpow2.f32 %v2477_v36 }
 0x439   :  { %2726 = vpow2.f32 %v2478_v55 }
 0x43a   :  { %2728 = vtanh.f32 %v1285_v53 }
 0x441   :  { %v2723_v4 = vpop.eup %2722 }
 0x442   :  { %v2725_v7 = vpop.eup %2724  ;;  %v1290_v50 = vadd.f32 1.0, %v2723_v4 }
 0x443   :  { %v1296_v49 = vadd.f32 1.0, %v2725_v7  ;;  %v2727_v13 = vpop.eup %2726 }
 0x444   :  { %2730 = vrcp.f32 %v1290_v50  ;;  %v2729_v14 = vpop.eup %2728  ;;  %v1303_v25 = vadd.f32 1.0, %v2727_v13 }
 0x445   :  { %2732 = vrcp.f32 %v1296_v49 }
 0x446   :  { %2734 = vrcp.f32 %v1303_v25 }
 0x44e   :  { %v2731_v18 = vpop.eup %2730 }
 0x44f   :  { %v2733_v21 = vpop.eup %2732  ;;  %v1307_v22 = vmul.f32 %v2731_v18, %v2729_v14 }
 0x450   :  { %v1306_v48 = vmul.f32 %v2733_v21, %v3504_v15  ;;  %v2735_v27 = vpop.eup %2734 }
 0x452   :  { %v3622_v39 = vadd.f32 %v1307_v22, %v1306_v48 }
 0x454   :  { %2736 = vtanh.f32 %v3622_v39 }
 0x45e   :  { %v2737_v45 = vpop.eup %2736 }
 0x45f   :  { %v1310_v44 = vmul.f32 %v2737_v45, %v2735_v27 }
 0x461   :  { %v1312_v53 = vcombine.high %v1310_v44, %v1310_v44  ;;  %v1319_v20 = vrot.slane %v1310_v44, %v3399_v51  ;;  %v1381_v23 = vpack.c.bf16 %v1310_v44, %v1310_v44 }
 0x463   :  { %v1326_v31 = vrot.slane %v1312_v53, %v3399_v51  ;;  %v1327_v3 = vcombine.high %v1319_v20, %v1319_v20  ;;  %v1335_v35 = vrot.slane %v1319_v20, %v3399_v51  ;;  %2479 = vst.sshfl [vmem:[#allocation3 + $0x3] sm:$0x1 pattern:$0x73625140] %v1319_v20  ;;  %1415 = vmatmul.mubr.bf16.vlgmr.msra.gmra.mrb[16].mxu0 %v1381_v23 }
 0x464   :  { %1456 = vmatmul.mubr.bf16.vlgmr.msra.gmra.mrb[48].mxu1 %v1381_v23  ;;  %1564 = vmatpush1.bf16.msra.mxu0 %v3513_v42 }
 0x465   :  { %1605 = vmatpush1.bf16.msra.mxu1 %v3209_v56  ;;  %v1328_v15 = vcombine.high %v1326_v31, %v1326_v31  ;;  %v1342_v52 = vrot.slane %v1326_v31, %v3399_v51  ;;  %v1349_v28 = vrot.slane %v1327_v3, %v3399_v51  ;;  %v1357_v54 = vcombine.high %v1335_v35, %v1335_v35 }
 0x466   :  { %2480 = vst.sshfl [vmem:[#allocation3 + $0xb] sm:$0x1 pattern:$0x73625140] %v1327_v3  ;;  %1565 = vmatprep.subr.bf16.mxu0 %v3522_v17  ;;  %1606 = vmatprep.subr.bf16.mxu1 %v3215_v57  ;;  %v3667_v57 = vld [vmem:[%s3959_s4 + $0xc] ss:$16 sps:$4 sm:$0xff]  }
 0x467   :  { %2481 = vst.sshfl [vmem:[#allocation3 + $0x23] sm:$0x1 pattern:$0x73625140] %v1326_v31  ;;  %1595 = vmatprep.mubr.bf16.mxu0 %v3986_v33  ;;  %v1356_v37 = vrot.slane %v1328_v15, %v3399_v51  ;;  %v1358_v36 = vcombine.high %v1342_v52, %v1342_v52  ;;  %v1359_v55 = vcombine.high %v1349_v28, %v1349_v28  ;;  %1371 = vst [vmem:[#allocation3 + $0x13] sm:$0x1] %v1357_v54 }
 0x468   :  { %2482 = vst.sshfl [vmem:[#allocation3 + $0x2b] sm:$0x1 pattern:$0x73625140] %v1328_v15  ;;  %1636 = vmatprep.mubr.bf16.mxu1 %v3986_v33  ;;  %1566 = vmatpush1.bf16.msra.mxu0 %v3464_v41 }
 0x469   :  { %1607 = vmatpush1.bf16.msra.mxu1 %v3224_v58  ;;  %v1360_v56 = vcombine.high %v1356_v37, %v1356_v37  ;;  %1372 = vst [vmem:[#allocation3 + $0x1b] sm:$0x1] %v1359_v55  ;;  %1375 = vst [vmem:[#allocation3 + $0x33] sm:$0x1] %v1358_v36  ;;  %1567 = vmatprep.subr.bf16.mxu0 %v3534_v26 }
 0x46a   :  { %1608 = vmatprep.subr.bf16.mxu1 %v3231_v59 }
 0x46b   :  { %1376 = vst [vmem:[#allocation3 + $0x3b] sm:$0x1] %v1360_v56 }
 0x46c   :  { %1568 = vmatpush1.bf16.msra.mxu0 %v3541_v29 }
 0x46d   :  { %1609 = vmatpush1.bf16.msra.mxu1 %v3237_v60  ;;  %1569 = vmatprep.subr.bf16.mxu0 %v3548_v30  ;;  %v3989_v60 = vld [vmem:[#allocation12_spill] sm:$0xff] }
 0x46e   :  { %1610 = vmatprep.subr.bf16.mxu1 %v3243_v61 }
 0x470   :  { %1570 = vmatpush1.bf16.msra.mxu0 %v3555_v32 }
 0x471   :  { %1611 = vmatpush1.bf16.msra.mxu1 %v3249_v62  ;;  %1571 = vmatprep.subr.bf16.mxu0 %v3562_v34  ;;  %v3990_v62 = vld [vmem:[#allocation21_spill] sm:$0xff] }
 0x472   :  { %1612 = vmatprep.subr.bf16.mxu1 %v3256_v63 }
 0x474   :  { %1572 = vmatpush1.bf16.msra.mxu0 %v3569_v40 }
 0x475   :  { %1613 = vmatpush1.bf16.msra.mxu1 %v3262_v0  ;;  %1573 = vmatprep.subr.bf16.mxu0 %v3576_v8 }
 0x476   :  { %1614 = vmatprep.subr.bf16.mxu1 %v3268_v1 }
 0x478   :  { %1574 = vmatpush1.bf16.msra.mxu0 %v3583_v38 }
 0x479   :  { %1615 = vmatpush1.bf16.msra.mxu1 %v3274_v5  ;;  %1575 = vmatprep.subr.bf16.mxu0 %v3590_v43  ;;  %v3991_v5 = vld [vmem:[#allocation13_spill] sm:$0xff] }
 0x47a   :  { %1616 = vmatprep.subr.bf16.mxu1 %v3281_v6 }
 0x47c   :  { %1576 = vmatpush1.bf16.msra.mxu0 %v3597_v47 }
 0x47d   :  { %1617 = vmatpush1.bf16.msra.mxu1 %v3287_v9  ;;  %1577 = vmatprep.subr.bf16.mxu0 %v3604_v46  ;;  %v3992_v9 = vld [vmem:[#allocation22_spill] sm:$0xff] }
 0x47e   :  { %1618 = vmatprep.subr.bf16.mxu1 %v3293_v10 }
 0x480   :  { %1578 = vmatpush1.bf16.msra.mxu0 %v3611_v24 }
 0x481   :  { %1619 = vmatpush1.bf16.msra.mxu1 %v3299_v12  ;;  %1744 = vmatprep.subr.bf16.mxu0 %v3495_v11 }
 0x482   :  { %1785 = vmatprep.subr.bf16.mxu1 %v3667_v57 }
 0x536   :  { %v1416_v58 = vpop.f32.mrb[16].mxu0 }
 0x537   :  { %v1457_v59 = vpop.f32.mrb[48].mxu1  ;;  %v1464_v61 = vadd.f32 %v1416_v58, %v3989_v60  ;;  %v1418_v0 = vpop.f32.mrb[17].mxu0 }
 0x538   :  { %v1466_v63 = vadd.f32 %v1457_v59, %v3990_v62  ;;  %v1459_v1 = vpop.f32.mrb[49].mxu1  ;;  %v1465_v6 = vadd.f32 %v1418_v0, %v3991_v5  ;;  %v1420_v12 = vpop.f32.mrb[18].mxu0 }
 0x539   :  { %v1467_v10 = vadd.f32 %v1459_v1, %v3992_v9  ;;  %v1461_v4 = vpop.f32.mrb[50].mxu1  ;;  %v2483_v7 = vmul.f32 -1.442695, %v1464_v61  ;;  %v1421_v50 = vpop.f32.mrb[19].mxu0  ;;  %v3694_v61 = vld [vmem:[%s3959_s4 + $0x2c] ss:$16 sps:$4 sm:$0xff]  }
 0x53a   :  { %v1462_v49 = vpop.f32.mrb[51].mxu1  ;;  %v2484_v13 = vmul.f32 -1.442695, %v1465_v6  ;;  %v3704_v1 = vld [vmem:[%s3959_s4 + $0x28] ss:$16 sps:$4 sm:$0xff]  }
 0x53b   :  { %2738 = vpow2.f32 %v2483_v7  ;;  %v2485_v14 = vmul.f32 -1.442695, %v1467_v10  ;;  %v3711_v6 = vld [vmem:[%s3959_s4 + $0x4c] ss:$16 sps:$4 sm:$0xff]   ;;  %v3718_v9 = vld [vmem:[%s3959_s4 + $0x48] ss:$16 sps:$4 sm:$0xff]  }
 0x53c   :  { %2740 = vpow2.f32 %v2484_v13  ;;  %v3725_v10 = vld [vmem:[%s3959_s4 + $0x6c] ss:$16 sps:$4 sm:$0xff]   ;;  %v3732_v12 = vld [vmem:[%s3959_s4 + $0x68] ss:$16 sps:$4 sm:$0xff]  }
 0x53d   :  { %2742 = vpow2.f32 %v2485_v14  ;;  %v3739_v4 = vld [vmem:[%s3959_s4 + $0x8c] ss:$16 sps:$4 sm:$0xff]   ;;  %v3746_v7 = vld [vmem:[%s3959_s4 + $0x88] ss:$16 sps:$4 sm:$0xff]  }
 0x53e   :  { %2744 = vtanh.f32 %v1466_v63  ;;  %v3753_v50 = vld [vmem:[%s3959_s4 + $0xac] ss:$16 sps:$4 sm:$0xff]   ;;  %v3760_v49 = vld [vmem:[%s3959_s4 + $0xa8] ss:$16 sps:$4 sm:$0xff]  }
 0x53f   :  { %v3767_v13 = vld [vmem:[%s3959_s4 + $0xcc] ss:$16 sps:$4 sm:$0xff]   ;;  %v3774_v14 = vld [vmem:[%s3959_s4 + $0xc8] ss:$16 sps:$4 sm:$0xff]  }
 0x545   :  { %v2739_v18 = vpop.eup %2738 }
 0x546   :  { %v2741_v21 = vpop.eup %2740  ;;  %v1471_v22 = vadd.f32 1.0, %v2739_v18  ;;  %v3781_v18 = vld [vmem:[%s3959_s4 + $0xec] ss:$16 sps:$4 sm:$0xff]  }
 0x547   :  { %v1477_v25 = vadd.f32 1.0, %v2741_v21  ;;  %v2743_v48 = vpop.eup %2742  ;;  %v3788_v21 = vld [vmem:[%s3959_s4 + $0xe8] ss:$16 sps:$4 sm:$0xff]  }
 0x548   :  { %2746 = vrcp.f32 %v1471_v22  ;;  %v2745_v27 = vpop.eup %2744  ;;  %v1484_v20 = vadd.f32 1.0, %v2743_v48  ;;  %v3993_v48 = vld [vmem:[#allocation14_spill] sm:$0xff] }
 0x549   :  { %2748 = vrcp.f32 %v1477_v25 }
 0x54a   :  { %2750 = vrcp.f32 %v1484_v20 }
 0x552   :  { %v2747_v45 = vpop.eup %2746 }
 0x553   :  { %v2749_v44 = vpop.eup %2748  ;;  %v1488_v53 = vmul.f32 %v2747_v45, %v2745_v27  ;;  %v3994_v45 = vld [vmem:[#allocation23_spill] sm:$0xff] }
 0x554   :  { %v1487_v23 = vmul.f32 %v2749_v44, %v3622_v39  ;;  %v2751_v3 = vpop.eup %2750  ;;  %v3685_v39 = vld [vmem:[%s3959_s4 + $0x8] ss:$16 sps:$4 sm:$0xff]  }
 0x556   :  { %v3675_v31 = vadd.f32 %v1488_v53, %v1487_v23  ;;  %v3995_v23 = vld [vmem:[#allocation15_spill] sm:$0xff] }
 0x558   :  { %2752 = vtanh.f32 %v3675_v31 }
 0x562   :  { %v2753_v35 = vpop.eup %2752 }
 0x563   :  { %v1491_v15 = vmul.f32 %v2753_v35, %v2751_v3  ;;  %v3996_v35 = vld [vmem:[#allocation24_spill] sm:$0xff] }
 0x565   :  { %v1493_v52 = vcombine.high %v1491_v15, %v1491_v15  ;;  %v1500_v28 = vrot.slane %v1491_v15, %v3399_v51  ;;  %v1562_v54 = vpack.c.bf16 %v1491_v15, %v1491_v15 }
 0x567   :  { %v1507_v37 = vrot.slane %v1493_v52, %v3399_v51  ;;  %v1508_v36 = vcombine.high %v1500_v28, %v1500_v28  ;;  %v1516_v55 = vrot.slane %v1500_v28, %v3399_v51  ;;  %2486 = vst.sshfl [vmem:[#allocation3 + $0x4] sm:$0x1 pattern:$0x73625140] %v1500_v28  ;;  %1596 = vmatmul.mubr.bf16.vlgmr.msra.gmra.mrb[20].mxu0 %v1562_v54 }
 0x568   :  { %1637 = vmatmul.mubr.bf16.vlgmr.msra.gmra.mrb[52].mxu1 %v1562_v54  ;;  %1745 = vmatpush1.bf16.msra.mxu0 %v3513_v42 }
 0x569   :  { %1786 = vmatpush1.bf16.msra.mxu1 %v3685_v39  ;;  %v1509_v56 = vcombine.high %v1507_v37, %v1507_v37  ;;  %v1523_v58 = vrot.slane %v1507_v37, %v3399_v51  ;;  %v1530_v59 = vrot.slane %v1508_v36, %v3399_v51  ;;  %v1538_v60 = vcombine.high %v1516_v55, %v1516_v55 }
 0x56a   :  { %2487 = vst.sshfl [vmem:[#allocation3 + $0xc] sm:$0x1 pattern:$0x73625140] %v1508_v36  ;;  %1746 = vmatprep.subr.bf16.mxu0 %v3522_v17  ;;  %1787 = vmatprep.subr.bf16.mxu1 %v3694_v61 }
 0x56b   :  { %2488 = vst.sshfl [vmem:[#allocation3 + $0x24] sm:$0x1 pattern:$0x73625140] %v1507_v37  ;;  %1776 = vmatprep.mubr.bf16.mxu0 %v3986_v33  ;;  %v1537_v62 = vrot.slane %v1509_v56, %v3399_v51  ;;  %v1539_v63 = vcombine.high %v1523_v58, %v1523_v58  ;;  %v1540_v0 = vcombine.high %v1530_v59, %v1530_v59  ;;  %1552 = vst [vmem:[#allocation3 + $0x14] sm:$0x1] %v1538_v60 }
 0x56c   :  { %2489 = vst.sshfl [vmem:[#allocation3 + $0x2c] sm:$0x1 pattern:$0x73625140] %v1509_v56  ;;  %1817 = vmatprep.mubr.bf16.mxu1 %v3986_v33  ;;  %1747 = vmatpush1.bf16.msra.mxu0 %v3464_v41 }
 0x56d   :  { %1788 = vmatpush1.bf16.msra.mxu1 %v3704_v1  ;;  %v1541_v5 = vcombine.high %v1537_v62, %v1537_v62  ;;  %1553 = vst [vmem:[#allocation3 + $0x1c] sm:$0x1] %v1540_v0  ;;  %1556 = vst [vmem:[#allocation3 + $0x34] sm:$0x1] %v1539_v63  ;;  %1748 = vmatprep.subr.bf16.mxu0 %v3534_v26 }
 0x56e   :  { %1789 = vmatprep.subr.bf16.mxu1 %v3711_v6 }
 0x56f   :  { %1557 = vst [vmem:[#allocation3 + $0x3c] sm:$0x1] %v1541_v5 }
 0x570   :  { %1749 = vmatpush1.bf16.msra.mxu0 %v3541_v29 }
 0x571   :  { %1790 = vmatpush1.bf16.msra.mxu1 %v3718_v9  ;;  %1750 = vmatprep.subr.bf16.mxu0 %v3548_v30 }
 0x572   :  { %1791 = vmatprep.subr.bf16.mxu1 %v3725_v10 }
 0x574   :  { %1751 = vmatpush1.bf16.msra.mxu0 %v3555_v32 }
 0x575   :  { %1792 = vmatpush1.bf16.msra.mxu1 %v3732_v12  ;;  %1752 = vmatprep.subr.bf16.mxu0 %v3562_v34 }
 0x576   :  { %1793 = vmatprep.subr.bf16.mxu1 %v3739_v4 }
 0x578   :  { %1753 = vmatpush1.bf16.msra.mxu0 %v3569_v40 }
 0x579   :  { %1794 = vmatpush1.bf16.msra.mxu1 %v3746_v7  ;;  %1754 = vmatprep.subr.bf16.mxu0 %v3576_v8 }
 0x57a   :  { %1795 = vmatprep.subr.bf16.mxu1 %v3753_v50 }
 0x57c   :  { %1755 = vmatpush1.bf16.msra.mxu0 %v3583_v38 }
 0x57d   :  { %1796 = vmatpush1.bf16.msra.mxu1 %v3760_v49  ;;  %1756 = vmatprep.subr.bf16.mxu0 %v3590_v43 }
 0x57e   :  { %1797 = vmatprep.subr.bf16.mxu1 %v3767_v13 }
 0x580   :  { %1757 = vmatpush1.bf16.msra.mxu0 %v3597_v47 }
 0x581   :  { %1798 = vmatpush1.bf16.msra.mxu1 %v3774_v14  ;;  %1758 = vmatprep.subr.bf16.mxu0 %v3604_v46 }
 0x582   :  { %1799 = vmatprep.subr.bf16.mxu1 %v3781_v18 }
 0x584   :  { %1759 = vmatpush1.bf16.msra.mxu0 %v3611_v24 }
 0x585   :  { %1800 = vmatpush1.bf16.msra.mxu1 %v3788_v21  ;;  %1925 = vmatprep.subr.bf16.mxu0 %v3495_v11 }
 0x586   :  { %1966 = vmatprep.subr.bf16.mxu1 %v3667_v57 }
 0x63a   :  { %v1597_v22 = vpop.f32.mrb[20].mxu0 }
 0x63b   :  { %v1638_v25 = vpop.f32.mrb[52].mxu1  ;;  %v1645_v27 = vadd.f32 %v1597_v22, %v3993_v48  ;;  %v1599_v53 = vpop.f32.mrb[21].mxu0 }
 0x63c   :  { %v1647_v44 = vadd.f32 %v1638_v25, %v3994_v45  ;;  %v1640_v20 = vpop.f32.mrb[53].mxu1  ;;  %v1646_v3 = vadd.f32 %v1599_v53, %v3995_v23  ;;  %v1601_v52 = vpop.f32.mrb[22].mxu0 }
 0x63d   :  { %v1648_v15 = vadd.f32 %v1640_v20, %v3996_v35  ;;  %v1642_v28 = vpop.f32.mrb[54].mxu1  ;;  %v2490_v54 = vmul.f32 -1.442695, %v1645_v27  ;;  %v1602_v37 = vpop.f32.mrb[23].mxu0 }
 0x63e   :  { %v1643_v36 = vpop.f32.mrb[55].mxu1  ;;  %v2491_v11 = vmul.f32 -1.442695, %v1646_v3 }
 0x63f   :  { %2754 = vpow2.f32 %v2490_v54  ;;  %v2492_v57 = vmul.f32 -1.442695, %v1648_v15 }
 0x640   :  { %2756 = vpow2.f32 %v2491_v11 }
 0x641   :  { %2758 = vpow2.f32 %v2492_v57 }
 0x642   :  { %2760 = vtanh.f32 %v1647_v44 }
 0x649   :  { %v2755_v55 = vpop.eup %2754 }
 0x64a   :  { %v2757_v56 = vpop.eup %2756  ;;  %v1652_v58 = vadd.f32 1.0, %v2755_v55 }
 0x64b   :  { %v1658_v59 = vadd.f32 1.0, %v2757_v56  ;;  %v2759_v60 = vpop.eup %2758 }
 0x64c   :  { %2762 = vrcp.f32 %v1652_v58  ;;  %v2761_v62 = vpop.eup %2760  ;;  %v1665_v22 = vadd.f32 1.0, %v2759_v60  ;;  %v2659_v60 = vld [vmem:[%s3961_s6] sm:$0xff]  }
 0x64d   :  { %2764 = vrcp.f32 %v1658_v59 }
 0x64e   :  { %2766 = vrcp.f32 %v1665_v22 }
 0x656   :  { %v2763_v63 = vpop.eup %2762 }
 0x657   :  { %v2765_v0 = vpop.eup %2764  ;;  %v1669_v5 = vmul.f32 %v2763_v63, %v2761_v62 }
 0x658   :  { %v1668_v25 = vmul.f32 %v2765_v0, %v3675_v31  ;;  %v2767_v27 = vpop.eup %2766 }
 0x65a   :  { %v3798_v48 = vadd.f32 %v1669_v5, %v1668_v25 }
 0x65c   :  { %2768 = vtanh.f32 %v3798_v48 }
 0x666   :  { %v2769_v45 = vpop.eup %2768 }
 0x667   :  { %v1672_v53 = vmul.f32 %v2769_v45, %v2767_v27 }
 0x669   :  { %v1674_v44 = vcombine.high %v1672_v53, %v1672_v53  ;;  %v1681_v20 = vrot.slane %v1672_v53, %v3399_v51  ;;  %v1743_v23 = vpack.c.bf16 %v1672_v53, %v1672_v53 }
 0x66b   :  { %v1688_v3 = vrot.slane %v1674_v44, %v3399_v51  ;;  %v1689_v35 = vcombine.high %v1681_v20, %v1681_v20  ;;  %v1697_v15 = vrot.slane %v1681_v20, %v3399_v51  ;;  %2493 = vst.sshfl [vmem:[#allocation3 + $0x5] sm:$0x1 pattern:$0x73625140] %v1681_v20  ;;  %1777 = vmatmul.mubr.bf16.vlgmr.msra.gmra.mrb[24].mxu0 %v1743_v23 }
 0x66c   :  { %1818 = vmatmul.mubr.bf16.vlgmr.msra.gmra.mrb[56].mxu1 %v1743_v23  ;;  %1926 = vmatpush1.bf16.msra.mxu0 %v3513_v42 }
 0x66d   :  { %1967 = vmatpush1.bf16.msra.mxu1 %v3685_v39  ;;  %v1690_v31 = vcombine.high %v1688_v3, %v1688_v3  ;;  %v1704_v52 = vrot.slane %v1688_v3, %v3399_v51  ;;  %v1711_v28 = vrot.slane %v1689_v35, %v3399_v51  ;;  %v1719_v54 = vcombine.high %v1697_v15, %v1697_v15  ;;  %v2661_v15 = vld [vmem:[%s3961_s6 + $0x8] sm:$0xff]  }
 0x66e   :  { %2494 = vst.sshfl [vmem:[#allocation3 + $0xd] sm:$0x1 pattern:$0x73625140] %v1689_v35  ;;  %1927 = vmatprep.subr.bf16.mxu0 %v3522_v17  ;;  %1968 = vmatprep.subr.bf16.mxu1 %v3694_v61  ;;  %v2660_v35 = vld [vmem:[%s3961_s6 + $0x48] sm:$0xff]  }
 0x66f   :  { %2495 = vst.sshfl [vmem:[#allocation3 + $0x25] sm:$0x1 pattern:$0x73625140] %v1688_v3  ;;  %1957 = vmatprep.mubr.bf16.mxu0 %v3986_v33  ;;  %v1718_v37 = vrot.slane %v1690_v31, %v3399_v51  ;;  %v1720_v36 = vcombine.high %v1704_v52, %v1704_v52  ;;  %v1721_v42 = vcombine.high %v1711_v28, %v1711_v28  ;;  %1733 = vst [vmem:[#allocation3 + $0x15] sm:$0x1] %v1719_v54 }
 0x670   :  { %2496 = vst.sshfl [vmem:[#allocation3 + $0x2d] sm:$0x1 pattern:$0x73625140] %v1690_v31  ;;  %1998 = vmatprep.mubr.bf16.mxu1 %v3986_v33  ;;  %1928 = vmatpush1.bf16.msra.mxu0 %v3464_v41  ;;  %v2658_v33 = vld [vmem:[%s3961_s6 + $0x40] sm:$0xff]   ;;  %v2662_v31 = vld [vmem:[%s3961_s6 + $0x50] sm:$0xff]  }
 0x671   :  { %1969 = vmatpush1.bf16.msra.mxu1 %v3704_v1  ;;  %v1722_v39 = vcombine.high %v1718_v37, %v1718_v37  ;;  %1734 = vst [vmem:[#allocation3 + $0x1d] sm:$0x1] %v1721_v42  ;;  %1737 = vst [vmem:[#allocation3 + $0x35] sm:$0x1] %v1720_v36  ;;  %1929 = vmatprep.subr.bf16.mxu0 %v3534_v26  ;;  %v3997_v26 = vld [vmem:[#allocation16_spill] sm:$0xff]  ;;  %v2663_v52 = vld [vmem:[%s3961_s6 + $0x10] sm:$0xff]  }
 0x672   :  { %1970 = vmatprep.subr.bf16.mxu1 %v3711_v6  ;;  %v2664_v28 = vld [vmem:[%s3961_s6 + $0x58] sm:$0xff]   ;;  %v2666_v37 = vld [vmem:[%s3961_s6 + $0x60] sm:$0xff]   ;;  %v2668_v42 = vld [vmem:[%s3961_s6 + $0x68] sm:$0xff]  }
 0x673   :  { %1738 = vst [vmem:[#allocation3 + $0x3d] sm:$0x1] %v1722_v39  ;;  %v2665_v54 = vld [vmem:[%s3961_s6 + $0x18] sm:$0xff]   ;;  %v2667_v36 = vld [vmem:[%s3961_s6 + $0x20] sm:$0xff]   ;;  %v2669_v39 = vld [vmem:[%s3961_s6 + $0x28] sm:$0xff]  }
 0x674   :  { %1930 = vmatpush1.bf16.msra.mxu0 %v3541_v29 }
 0x675   :  { %1971 = vmatpush1.bf16.msra.mxu1 %v3718_v9  ;;  %1931 = vmatprep.subr.bf16.mxu0 %v3548_v30  ;;  %v3998_v30 = vld [vmem:[#allocation25_spill] sm:$0xff] }
 0x676   :  { %1972 = vmatprep.subr.bf16.mxu1 %v3725_v10 }
 0x678   :  { %1932 = vmatpush1.bf16.msra.mxu0 %v3555_v32 }
 0x679   :  { %1973 = vmatpush1.bf16.msra.mxu1 %v3732_v12  ;;  %1933 = vmatprep.subr.bf16.mxu0 %v3562_v34 }
 0x67a   :  { %1974 = vmatprep.subr.bf16.mxu1 %v3739_v4 }
 0x67c   :  { %1934 = vmatpush1.bf16.msra.mxu0 %v3569_v40 }
 0x67d   :  { %1975 = vmatpush1.bf16.msra.mxu1 %v3746_v7  ;;  %1935 = vmatprep.subr.bf16.mxu0 %v3576_v8  ;;  %v3999_v8 = vld [vmem:[#allocation17_spill] sm:$0xff] }
 0x67e   :  { %1976 = vmatprep.subr.bf16.mxu1 %v3753_v50 }
 0x680   :  { %1936 = vmatpush1.bf16.msra.mxu0 %v3583_v38 }
 0x681   :  { %1977 = vmatpush1.bf16.msra.mxu1 %v3760_v49  ;;  %1937 = vmatprep.subr.bf16.mxu0 %v3590_v43  ;;  %v4000_v43 = vld [vmem:[#allocation26_spill] sm:$0xff] }
 0x682   :  { %1978 = vmatprep.subr.bf16.mxu1 %v3767_v13 }
 0x684   :  { %1938 = vmatpush1.bf16.msra.mxu0 %v3597_v47 }
 0x685   :  { %1979 = vmatpush1.bf16.msra.mxu1 %v3774_v14  ;;  %1939 = vmatprep.subr.bf16.mxu0 %v3604_v46 }
 0x686   :  { %1980 = vmatprep.subr.bf16.mxu1 %v3781_v18 }
 0x688   :  { %1940 = vmatpush1.bf16.msra.mxu0 %v3611_v24 }
 0x689   :  { %1981 = vmatpush1.bf16.msra.mxu1 %v3788_v21  ;;  %2527 = vmatprep.subr.bf16.mxu0 %v2658_v33  ;;  %v2670_v33 = vld [vmem:[%s3961_s6 + $0x70] sm:$0xff]  }
 0x73e   :  { %v1778_v41 = vpop.f32.mrb[24].mxu0 }
 0x73f   :  { %v1819_v17 = vpop.f32.mrb[56].mxu1  ;;  %v1826_v29 = vadd.f32 %v1778_v41, %v3997_v26  ;;  %v1780_v34 = vpop.f32.mrb[25].mxu0  ;;  %v2671_v41 = vld [vmem:[%s3961_s6 + $0x30] sm:$0xff]   ;;  %v2673_v26 = vld [vmem:[%s3961_s6 + $0x38] sm:$0xff]  }
 0x740   :  { %v1828_v32 = vadd.f32 %v1819_v17, %v3998_v30  ;;  %v1821_v40 = vpop.f32.mrb[57].mxu1  ;;  %v1827_v38 = vadd.f32 %v1780_v34, %v3999_v8  ;;  %v1782_v46 = vpop.f32.mrb[26].mxu0  ;;  %v2672_v17 = vld [vmem:[%s3961_s6 + $0x78] sm:$0xff]   ;;  %s2906_s6 = smov [#allocation6]  }
 0x741   :  { %v1829_v47 = vadd.f32 %v1821_v40, %v4000_v43  ;;  %v1823_v24 = vpop.f32.mrb[58].mxu1  ;;  %v2497_v61 = vmul.f32 -1.442695, %v1826_v29  ;;  %v1783_v1 = vpop.f32.mrb[27].mxu0  ;;  %v4002_v43 = vld [vmem:[#allocation19_spill] sm:$0xff]  ;;  %s2362_s22 = sshll.u32 %s2906_s6, 4  ;;  %s2363_s22 = int_to_ptr.vmem [resolvable:$true] %s2362_s22 }
 0x742   :  { %v1824_v6 = vpop.f32.mrb[59].mxu1  ;;  %v2498_v9 = vmul.f32 -1.442695, %v1827_v38  ;;  %s2834_s23 = scalar_lea.vmem %s2363_s22, 128  ;;  %p2839_p1 = scmp.lt.s32.totalorder %s2363_s22, %s2363_s22 }
 0x743   :  { %2770 = vpow2.f32 %v2497_v61  ;;  %v2499_v10 = vmul.f32 -1.442695, %v1829_v47  ;;  %p2835_p0 = scmp.ne.s32.totalorder %s2363_s22, %s2834_s23  ;;  %p2840_p2 = scmp.lt.s32.totalorder %s2834_s23, %s2834_s23 }
 0x744   :  { %2772 = vpow2.f32 %v2498_v9 }
 0x745   :  { %2774 = vpow2.f32 %v2499_v10  ;;  %p2841_p3 = por %p2840_p2, %p2839_p1 }
 0x746   :  { %2776 = vtanh.f32 %v1828_v32  ;;  %v4001_v32 = vld [vmem:[#allocation18_spill] sm:$0xff] }
 0x747   :  { %p2842_p4 = pnand %p2841_p3, %p2835_p0 }
 0x74d   :  { %v2771_v12 = vpop.eup %2770 }
 0x74e   :  { %v2773_v4 = vpop.eup %2772  ;;  %v1833_v7 = vadd.f32 1.0, %v2771_v12 }
 0x74f   :  { %v1839_v50 = vadd.f32 1.0, %v2773_v4  ;;  %v2775_v49 = vpop.eup %2774 }
 0x750   :  { %2778 = vrcp.f32 %v1833_v7  ;;  %v2777_v13 = vpop.eup %2776  ;;  %v1846_v11 = vadd.f32 1.0, %v2775_v49 }
 0x751   :  { %2780 = vrcp.f32 %v1839_v50 }
 0x752   :  { %2782 = vrcp.f32 %v1846_v11 }
 0x75a   :  { %v2779_v14 = vpop.eup %2778 }
 0x75b   :  { %v2781_v18 = vpop.eup %2780  ;;  %v1850_v21 = vmul.f32 %v2779_v14, %v2777_v13 }
 0x75c   :  { %v1849_v57 = vmul.f32 %v2781_v18, %v3798_v48  ;;  %v2783_v56 = vpop.eup %2782 }
 0x75e   :  { %v3847_v55 = vadd.f32 %v1850_v21, %v1849_v57 }
 0x760   :  { %2784 = vtanh.f32 %v3847_v55 }
 0x76a   :  { %v2785_v58 = vpop.eup %2784 }
 0x76b   :  { %v1853_v59 = vmul.f32 %v2785_v58, %v2783_v56 }
 0x76d   :  { %v1855_v62 = vcombine.high %v1853_v59, %v1853_v59  ;;  %v1862_v63 = vrot.slane %v1853_v59, %v3399_v51  ;;  %v1924_v0 = vpack.c.bf16 %v1853_v59, %v1853_v59 }
 0x76f   :  { %v1869_v5 = vrot.slane %v1855_v62, %v3399_v51  ;;  %v1870_v22 = vcombine.high %v1862_v63, %v1862_v63  ;;  %v1878_v25 = vrot.slane %v1862_v63, %v3399_v51  ;;  %2500 = vst.sshfl [vmem:[#allocation3 + $0x6] sm:$0x1 pattern:$0x73625140] %v1862_v63  ;;  %1958 = vmatmul.mubr.bf16.vlgmr.msra.gmra.mrb[28].mxu0 %v1924_v0 }
 0x770   :  { %1999 = vmatmul.mubr.bf16.vlgmr.msra.gmra.mrb[60].mxu1 %v1924_v0  ;;  %2528 = vmatpush3.bf16.xpose.msra.mxu0 %v2659_v60 }
 0x771   :  { %v1871_v48 = vcombine.high %v1869_v5, %v1869_v5  ;;  %v1885_v27 = vrot.slane %v1869_v5, %v3399_v51  ;;  %v1892_v45 = vrot.slane %v1870_v22, %v3399_v51  ;;  %v1900_v53 = vcombine.high %v1878_v25, %v1878_v25  ;;  %2501 = vst.sshfl [vmem:[#allocation3 + $0xe] sm:$0x1 pattern:$0x73625140] %v1870_v22 }
 0x772   :  { %2502 = vst.sshfl [vmem:[#allocation3 + $0x26] sm:$0x1 pattern:$0x73625140] %v1869_v5  ;;  %2529 = vmatprep.subr.bf16.mxu0 %v2660_v35 }
 0x773   :  { %v1899_v44 = vrot.slane %v1871_v48, %v3399_v51  ;;  %v1901_v20 = vcombine.high %v1885_v27, %v1885_v27  ;;  %v1902_v23 = vcombine.high %v1892_v45, %v1892_v45  ;;  %1914 = vst [vmem:[#allocation3 + $0x16] sm:$0x1] %v1900_v53  ;;  %2503 = vst.sshfl [vmem:[#allocation3 + $0x2e] sm:$0x1 pattern:$0x73625140] %v1871_v48 }
 0x775   :  { %v1903_v3 = vcombine.high %v1899_v44, %v1899_v44  ;;  %1915 = vst [vmem:[#allocation3 + $0x1e] sm:$0x1] %v1902_v23  ;;  %1918 = vst [vmem:[#allocation3 + $0x36] sm:$0x1] %v1901_v20 }
 0x777   :  { %1919 = vst [vmem:[#allocation3 + $0x3e] sm:$0x1] %v1903_v3 }
 0x778   :  { %2530 = vmatpush3.bf16.xpose.msra.mxu0 %v2661_v15 }
 0x779   :  { %2531 = vmatprep.subr.bf16.mxu0 %v2662_v31 }
 0x780   :  { %2532 = vmatpush3.bf16.xpose.msra.mxu0 %v2663_v52 }
 0x781   :  { %2533 = vmatprep.subr.bf16.mxu0 %v2664_v28 }
 0x788   :  { %2534 = vmatpush3.bf16.xpose.msra.mxu0 %v2665_v54 }
 0x789   :  { %2535 = vmatprep.subr.bf16.mxu0 %v2666_v37 }
 0x790   :  { %2536 = vmatpush3.bf16.xpose.msra.mxu0 %v2667_v36 }
 0x791   :  { %2537 = vmatprep.subr.bf16.mxu0 %v2668_v42 }
 0x798   :  { %2538 = vmatpush3.bf16.xpose.msra.mxu0 %v2669_v39 }
 0x799   :  { %2539 = vmatprep.subr.bf16.mxu0 %v2670_v33 }
 0x7a0   :  { %2540 = vmatpush3.bf16.xpose.msra.mxu0 %v2671_v41 }
 0x7a1   :  { %2541 = vmatprep.subr.bf16.mxu0 %v2672_v17 }
 0x7a8   :  { %2542 = vmatpush3.bf16.xpose.msra.mxu0 %v2673_v26 }
 0x842   :  { %v1959_v29 = vpop.f32.mrb[28].mxu0 }
 0x843   :  { %v2000_v30 = vpop.f32.mrb[60].mxu1  ;;  %v2007_v34 = vadd.f32 %v1959_v29, %v4001_v32  ;;  %v1961_v8 = vpop.f32.mrb[29].mxu0 }
 0x844   :  { %v2009_v40 = vadd.f32 %v2000_v30, %v3388_v19  ;;  %v2002_v38 = vpop.f32.mrb[61].mxu1  ;;  %v2008_v47 = vadd.f32 %v1961_v8, %v4002_v43  ;;  %v1963_v24 = vpop.f32.mrb[30].mxu0 }
 0x845   :  { %v2010_v46 = vadd.f32 %v2002_v38, %v3390_v2  ;;  %v2004_v61 = vpop.f32.mrb[62].mxu1  ;;  %v2504_v1 = vmul.f32 -1.442695, %v2007_v34  ;;  %v1964_v6 = vpop.f32.mrb[31].mxu0 }
 0x846   :  { %v2005_v9 = vpop.f32.mrb[63].mxu1  ;;  %v2505_v10 = vmul.f32 -1.442695, %v2008_v47 }
 0x847   :  { %2786 = vpow2.f32 %v2504_v1  ;;  %v2506_v12 = vmul.f32 -1.442695, %v2010_v46 }
 0x848   :  { %2788 = vpow2.f32 %v2505_v10 }
 0x849   :  { %2790 = vpow2.f32 %v2506_v12 }
 0x84a   :  { %2792 = vtanh.f32 %v2009_v40 }
 0x851   :  { %v2787_v4 = vpop.eup %2786 }
 0x852   :  { %v2789_v7 = vpop.eup %2788  ;;  %v2014_v50 = vadd.f32 1.0, %v2787_v4 }
 0x853   :  { %v2020_v19 = vadd.f32 1.0, %v2789_v7  ;;  %v2791_v49 = vpop.eup %2790 }
 0x854   :  { %2794 = vrcp.f32 %v2014_v50  ;;  %v2793_v13 = vpop.eup %2792  ;;  %v2027_v21 = vadd.f32 1.0, %v2791_v49 }
 0x855   :  { %2796 = vrcp.f32 %v2020_v19 }
 0x856   :  { %2798 = vrcp.f32 %v2027_v21 }
 0x85e   :  { %v2795_v2 = vpop.eup %2794 }
 0x85f   :  { %v2797_v14 = vpop.eup %2796  ;;  %v2031_v18 = vmul.f32 %v2795_v2, %v2793_v13 }
 0x860   :  { %v2030_v11 = vmul.f32 %v2797_v14, %v3847_v55  ;;  %v2799_v56 = vpop.eup %2798 }
 0x862   :  { %v2032_v57 = vadd.f32 %v2031_v18, %v2030_v11 }
 0x864   :  { %2800 = vtanh.f32 %v2032_v57  ;;  %2102 = vst [vmem:[#allocation8] sm:$0xff] %v2032_v57 }
 0x86e   :  { %v2801_v58 = vpop.eup %2800 }
 0x86f   :  { %v2034_v59 = vmul.f32 %v2801_v58, %v2799_v56 }
 0x871   :  { %v2036_v60 = vcombine.high %v2034_v59, %v2034_v59  ;;  %v2043_v62 = vrot.slane %v2034_v59, %v3399_v51  ;;  %2101 = vst [vmem:[#allocation6] sm:$0xff] %v2034_v59 }
 0x873   :  { %v2050_v63 = vrot.slane %v2036_v60, %v3399_v51  ;;  %v2051_v0 = vcombine.high %v2043_v62, %v2043_v62  ;;  %v2059_v5 = vrot.slane %v2043_v62, %v3399_v51  ;;  %2507 = vst.sshfl [vmem:[#allocation3 + $0x7] sm:$0x1 pattern:$0x73625140] %v2043_v62 }
 0x875   :  { %v2052_v22 = vcombine.high %v2050_v63, %v2050_v63  ;;  %v2066_v55 = vrot.slane %v2050_v63, %v3399_v51  ;;  %v2073_v25 = vrot.slane %v2051_v0, %v3399_v51  ;;  %v2081_v48 = vcombine.high %v2059_v5, %v2059_v5  ;;  %2508 = vst.sshfl [vmem:[#allocation3 + $0xf] sm:$0x1 pattern:$0x73625140] %v2051_v0 }
 0x876   :  { %2509 = vst.sshfl [vmem:[#allocation3 + $0x27] sm:$0x1 pattern:$0x73625140] %v2050_v63 }
 0x877   :  { %v2080_v27 = vrot.slane %v2052_v22, %v3399_v51  ;;  %v2082_v45 = vcombine.high %v2066_v55, %v2066_v55  ;;  %v2083_v53 = vcombine.high %v2073_v25, %v2073_v25  ;;  %2095 = vst [vmem:[#allocation3 + $0x17] sm:$0x1] %v2081_v48  ;;  %2510 = vst.sshfl [vmem:[#allocation3 + $0x2f] sm:$0x1 pattern:$0x73625140] %v2052_v22 }
 0x879   :  { %v2084_v44 = vcombine.high %v2080_v27, %v2080_v27  ;;  %2096 = vst [vmem:[#allocation3 + $0x1f] sm:$0x1] %v2083_v53  ;;  %2099 = vst [vmem:[#allocation3 + $0x37] sm:$0x1] %v2082_v45 }
 0x87a   :  { %v2103_v20 = vld [vmem:[#allocation3] sm:$0xff] }
 0x87b   :  { %2100 = vst [vmem:[#allocation3 + $0x3f] sm:$0x1] %v2084_v44 }
 0x87c   :  { %v2104_v23 = vld [vmem:[#allocation3 + $0x8] sm:$0xff] }
 0x87d   :  { %v2111_v3 = vpack.c.bf16 %v2104_v23, %v2103_v20  ;;  %v2107_v28 = vld [vmem:[#allocation3 + $0x20] sm:$0xff] }
 0x87e   :  { %v2105_v35 = vld [vmem:[#allocation3 + $0x10] sm:$0xff]  ;;  %v2108_v52 = vld [vmem:[#allocation3 + $0x28] sm:$0xff] }
 0x87f   :  { %2543 = vmatprep.mubr.bf16.mxu0 %v2111_v3  ;;  %v2113_v51 = vpack.c.bf16 %v2108_v52, %v2107_v28 }
 0x880   :  { %2544 = vmatmul.mubr.bf16.vlgmr.msra.gmra.mrb[32].mxu0 %v2111_v3  ;;  %v2106_v15 = vld [vmem:[#allocation3 + $0x18] sm:$0xff]  ;;  %v2109_v37 = vld [vmem:[#allocation3 + $0x30] sm:$0xff] }
 0x881   :  { %v2112_v31 = vpack.c.bf16 %v2106_v15, %v2105_v35 }
 0x882   :  { %v2110_v54 = vld [vmem:[#allocation3 + $0x38] sm:$0xff] }
 0x883   :  { %2545 = vmatprep.mubr.bf16.mxu0 %v2112_v31  ;;  %v2114_v36 = vpack.c.bf16 %v2110_v54, %v2109_v37 }
 0x888   :  { %2546 = vmatmul.mubr.bf16.gmra.mrb[36].mxu0 %v2112_v31 }
 0x889   :  { %2547 = vmatprep.mubr.bf16.mxu0 %v2113_v51 }
 0x890   :  { %2548 = vmatmul.mubr.bf16.gmra.mrb[40].mxu0 %v2113_v51 }
 0x891   :  { %2549 = vmatprep.mubr.bf16.mxu0 %v2114_v36 }
 0x898   :  { %2550 = vmatmul.mubr.bf16.gmra.mrb[44].mxu0 %v2114_v36 }
 0x899   :  { %2845 = shalt.err (!%p2842_p4)
}
 0x89a   :  { %s2846_s5 = scalar_lea.hbm %s3964_s9, 128 }
 0x89b   :  { %p2847_p5 = scmp.ne.s32.totalorder %s3964_s9, %s2846_s5  ;;  %p2850_p6 = scmp.lt.u32.totalorder %s2846_s5, %s3964_s9 }
 0x89d   :  { %p2852_p7 = pnand %p2850_p6, %p2847_p5 }
 0x89f   :  { %2855 = shalt.err (!%p2852_p7)
}
 0x8a0   :  { %2365 = dma.vmem_to_hbm [thread:$0]  %s2363_s22, 128, %s3964_s9, [#allocation7]  }
 0x8a1   :  { %s2907_s30 = smov [#allocation8]  }
 0x8a2   :  { %s2372_s11 = sshll.u32 %s2907_s30, 4  ;;  %s2373_s11 = int_to_ptr.vmem [resolvable:$true] %s2372_s11 }
 0x8a3   :  { %s2856_s12 = scalar_lea.vmem %s2373_s11, 128  ;;  %p2861_p9 = scmp.lt.s32.totalorder %s2373_s11, %s2373_s11 }
 0x8a4   :  { %p2857_p8 = scmp.ne.s32.totalorder %s2373_s11, %s2856_s12  ;;  %p2862_p10 = scmp.lt.s32.totalorder %s2856_s12, %s2856_s12 }
 0x8a6   :  { %p2863_p11 = por %p2862_p10, %p2861_p9 }
 0x8a8   :  { %p2864_p12 = pnand %p2863_p11, %p2857_p8 }
 0x8aa   :  { %2867 = shalt.err (!%p2864_p12)
}
 0x8ab   :  { %s2868_s0 = scalar_lea.hbm %s3965_s10, 128 }
 0x8ac   :  { %p2869_p13 = scmp.ne.s32.totalorder %s3965_s10, %s2868_s0  ;;  %p2872_p0 = scmp.lt.u32.totalorder %s2868_s0, %s3965_s10 }
 0x8ae   :  { %p2874_p1 = pnand %p2872_p0, %p2869_p13 }
 0x8b0   :  { %2877 = shalt.err (!%p2874_p1)
}
 0x8b1   :  { %2375 = dma.vmem_to_hbm [thread:$0]  %s2373_s11, 128, %s3965_s10, [#allocation7]   ;;  %v2147_v42 = vld [vmem:[%s3962_s7] sm:$0x3]  ;;  %v4003_v39 = vsub.s32 0, %v3323_v16  ;;  %v4004_v41 = vsub.s32 1, %v3323_v16 }
 0x8b2   :  { %s2908_s7 = smov [#allocation4]  }
 0x8b3   :  { %v2152_v33 = vrot.slane %v2147_v42, %v4003_v39  ;;  %v2156_v17 = vrot.slane %v2147_v42, %v4004_v41  ;;  %s2349_s10 = sshll.u32 %s2908_s7, 4  ;;  %s2350_s10 = int_to_ptr.vmem [resolvable:$true] %s2349_s10 }
 0x8b4   :  { %s2878_s20 = scalar_lea.vmem %s2350_s10, 2048  ;;  %p2883_p3 = scmp.lt.s32.totalorder %s2350_s10, %s2350_s10 }
 0x8b5   :  { %p2879_p2 = scmp.ne.s32.totalorder %s2350_s10, %s2878_s20  ;;  %p2884_p4 = scmp.lt.s32.totalorder %s2878_s20, %s2878_s20 }
 0x8b7   :  { %p2885_p5 = por %p2884_p4, %p2883_p3 }
 0x8b9   :  { %p2886_p6 = pnand %p2885_p5, %p2879_p2 }
 0x953   :  { %v2289_v26 = vpop.f32.mrb[32].mxu0 }
 0x954   :  { %v2290_v29 = vadd.f32 %v2289_v26, %v2152_v33  ;;  %v2291_v30 = vpop.f32.mrb[33].mxu0 }
 0x955   :  { %v2292_v32 = vadd.f32 %v2291_v30, %v2156_v17  ;;  %v2293_v34 = vpop.f32.mrb[34].mxu0 }
 0x956   :  { %2328 = vst [vmem:[#allocation4] sm:$0xff] %v2290_v29  ;;  %v2294_v40 = vadd.f32 %v2293_v34, %v2152_v33  ;;  %v2295_v8 = vpop.f32.mrb[35].mxu0 }
 0x957   :  { %2329 = vst [vmem:[#allocation4 + $0x8] sm:$0xff] %v2292_v32  ;;  %v2296_v38 = vadd.f32 %v2295_v8, %v2156_v17 }
 0x958   :  { %2330 = vst [vmem:[#allocation4 + $0x10] sm:$0xff] %v2294_v40 }
 0x959   :  { %2331 = vst [vmem:[#allocation4 + $0x18] sm:$0xff] %v2296_v38 }
 0x95b   :  { %v2299_v43 = vpop.f32.mrb[36].mxu0 }
 0x95c   :  { %v2300_v47 = vadd.f32 %v2299_v43, %v2152_v33  ;;  %v2301_v46 = vpop.f32.mrb[37].mxu0 }
 0x95d   :  { %v2302_v24 = vadd.f32 %v2301_v46, %v2156_v17  ;;  %v2303_v61 = vpop.f32.mrb[38].mxu0 }
 0x95e   :  { %2332 = vst [vmem:[#allocation4 + $0x20] sm:$0xff] %v2300_v47  ;;  %v2304_v16 = vadd.f32 %v2303_v61, %v2152_v33  ;;  %v2305_v1 = vpop.f32.mrb[39].mxu0 }
 0x95f   :  { %2333 = vst [vmem:[#allocation4 + $0x28] sm:$0xff] %v2302_v24  ;;  %v2306_v6 = vadd.f32 %v2305_v1, %v2156_v17 }
 0x960   :  { %2334 = vst [vmem:[#allocation4 + $0x30] sm:$0xff] %v2304_v16 }
 0x961   :  { %2335 = vst [vmem:[#allocation4 + $0x38] sm:$0xff] %v2306_v6 }
 0x963   :  { %v2309_v9 = vpop.f32.mrb[40].mxu0 }
 0x964   :  { %v2310_v10 = vadd.f32 %v2309_v9, %v2152_v33  ;;  %v2311_v12 = vpop.f32.mrb[41].mxu0 }
 0x965   :  { %v2312_v4 = vadd.f32 %v2311_v12, %v2156_v17  ;;  %v2313_v7 = vpop.f32.mrb[42].mxu0 }
 0x966   :  { %2336 = vst [vmem:[#allocation4 + $0x40] sm:$0xff] %v2310_v10  ;;  %v2314_v50 = vadd.f32 %v2313_v7, %v2152_v33  ;;  %v2315_v19 = vpop.f32.mrb[43].mxu0 }
 0x967   :  { %2337 = vst [vmem:[#allocation4 + $0x48] sm:$0xff] %v2312_v4  ;;  %v2316_v49 = vadd.f32 %v2315_v19, %v2156_v17 }
 0x968   :  { %2338 = vst [vmem:[#allocation4 + $0x50] sm:$0xff] %v2314_v50 }
 0x969   :  { %2339 = vst [vmem:[#allocation4 + $0x58] sm:$0xff] %v2316_v49 }
 0x96b   :  { %v2319_v13 = vpop.f32.mrb[44].mxu0 }
 0x96c   :  { %v2320_v2 = vadd.f32 %v2319_v13, %v2152_v33  ;;  %v2321_v14 = vpop.f32.mrb[45].mxu0 }
 0x96d   :  { %v2322_v18 = vadd.f32 %v2321_v14, %v2156_v17  ;;  %v2323_v21 = vpop.f32.mrb[46].mxu0 }
 0x96e   :  { %2340 = vst [vmem:[#allocation4 + $0x60] sm:$0xff] %v2320_v2  ;;  %v2324_v11 = vadd.f32 %v2323_v21, %v2152_v33  ;;  %v2325_v57 = vpop.f32.mrb[47].mxu0 }
 0x96f   :  { %2341 = vst [vmem:[#allocation4 + $0x68] sm:$0xff] %v2322_v18  ;;  %v2326_v56 = vadd.f32 %v2325_v57, %v2156_v17 }
 0x970   :  { %2342 = vst [vmem:[#allocation4 + $0x70] sm:$0xff] %v2324_v11 }
 0x971   :  { %2343 = vst [vmem:[#allocation4 + $0x78] sm:$0xff] %v2326_v56 }
 0x972   :  { %2889 = shalt.err (!%p2886_p6)
}
 0x973   :  { %s2890_s22 = scalar_lea.hbm %s3963_s8, 2048 }
 0x974   :  { %p2891_p7 = scmp.ne.s32.totalorder %s3963_s8, %s2890_s22  ;;  %p2894_p8 = scmp.lt.u32.totalorder %s2890_s22, %s3963_s8 }
 0x976   :  { %p2896_p9 = pnand %p2894_p8, %p2891_p7 }
 0x978   :  { %2899 = shalt.err (!%p2896_p9)
}
 0x979   :  { %s2909_s26 = smov 256   ;;  %s2910_s2 = smov 16  }
 0x97a   :  { %2355 = dma.vmem_to_hbm [thread:$0]  %s2350_s10, 2048, %s3963_s8, [#allocation5], %s2909_s26, %s2909_s26, %s2910_s2  }
 0x97b   :  { %2900 = dma.done.wait [#allocation5], 2048  }
 0x97c   :  { %2901 = vsyncadd [#allocation5], 4294965248 }
 0x97d   :  { %2902 = dma.done.wait [#allocation7], 256  }
 0x97e   :  { %2903 = vsyncadd [#allocation7], 4294967040 }
 0x97f   :  { %2385 = vsyncpa [#allocation5], 1 }
 0x980   :  { %2386 = vsyncpa [#allocation7], 1 }

</bundles_post_ra>
